<compile_context>
chip_gen: v7x
topology: tpu7x:2x2x1
jax: 0.10.0
libtpu: 0.0.40
codegen_flags: <defaults>
</compile_context>

<pallas_src>
import functools

import numpy as np
import jax
import jax.numpy as jnp
from jax.experimental import pallas as pl
from jax.experimental.pallas import tpu as pltpu


def sam_s_kernel(x_ref, ximg_ref, w1_ref, w2_ref, w3_ref, mask_ref,
                 x1_ref, img_ref, xh_ref, imgh_ref, *,
                 n_feat, K, H, W, pad):
    """Fused SAM_S forward for one batch element.

    x_ref    : (1, n_feat, H*W)        lane-dense activations
    ximg_ref : (1, 3, H*W)
    w1_ref   : (K*K, n_feat, n_feat)   conv1 weights, per-tap (O, I) matrices
    w2_ref   : (K*K, 3, n_feat)        conv2 weights
    w3_ref   : (K*K, n_feat, 3)        conv3 weights
    mask_ref : (K*K, 1, H*W)           per-tap border-validity masks (f32)
    x1_ref   : (1, n_feat, H*W)        output: conv1(x)*sigmoid(conv3(img)) + x
    img_ref  : (1, 3, H*W)             output: conv2(x) + x_img
    xh_ref   : (n_feat, H*W + 2*pad)   f32 halo scratch (VMEM)
    imgh_ref : (3, H*W + 2*pad)        f32 halo scratch (VMEM)
    """
    HW = H * W
    p = K // 2
    taps = [(kh, kw) for kh in range(K) for kw in range(K)]

    # Stage x into the halo scratch (single upfront f32 cast of the tile);
    # halo lanes are zeroed so masked-out reads stay finite.
    xh_ref[...] = jnp.zeros_like(xh_ref)
    xf = x_ref[0].astype(jnp.float32)                      # (n_feat, HW)
    xh_ref[:, pad:pad + HW] = xf                           # lane-aligned store

    # conv1(x) and conv2(x): per-tap (O, I) x (I, HW) MXU matmuls, f32 accum.
    acc1 = jnp.zeros((n_feat, HW), jnp.float32)
    acc2 = jnp.zeros((3, HW), jnp.float32)
    for kk, (kh, kw) in enumerate(taps):
        s = (kh - p) * W + (kw - p)                        # flat lane shift
        v = xh_ref[:, pad + s: pad + s + HW] * mask_ref[kk]
        acc1 = acc1 + jnp.dot(w1_ref[kk], v, preferred_element_type=jnp.float32)
        acc2 = acc2 + jnp.dot(w2_ref[kk], v, preferred_element_type=jnp.float32)

    # img = conv2(x) + x_img   (kept resident; also written out)
    img = acc2 + ximg_ref[0].astype(jnp.float32)           # (3, HW)
    img_ref[0] = img.astype(img_ref.dtype)

    # conv3(img): same per-tap matmul over the VMEM-resident img.
    imgh_ref[...] = jnp.zeros_like(imgh_ref)
    imgh_ref[:, pad:pad + HW] = img
    acc3 = jnp.zeros((n_feat, HW), jnp.float32)
    for kk, (kh, kw) in enumerate(taps):
        s = (kh - p) * W + (kw - p)
        v = imgh_ref[:, pad + s: pad + s + HW] * mask_ref[kk]
        acc3 = acc3 + jnp.dot(w3_ref[kk], v, preferred_element_type=jnp.float32)

    # x1 = conv1(x) * sigmoid(conv3(img)) + x
    x1_ref[0] = (acc1 * jax.nn.sigmoid(acc3) + xf).astype(x1_ref.dtype)


def _repack_weights(w, K):
    """OIHW -> (K*K, O, I) f32: one small channel-matmul matrix per tap."""
    O, I = w.shape[0], w.shape[1]
    return jnp.transpose(w, (2, 3, 0, 1)).reshape(K * K, O, I).astype(jnp.float32)


def _tap_masks(H, W, K):
    """Per-tap validity masks over the flattened H*W grid, shape (K*K,1,H*W)."""
    p = K // 2
    hh, ww = np.meshgrid(np.arange(H), np.arange(W), indexing="ij")
    masks = []
    for kh in range(K):
        for kw in range(K):
            dh, dw = kh - p, kw - p
            valid = ((hh + dh >= 0) & (hh + dh < H) &
                     (ww + dw >= 0) & (ww + dw < W))
            masks.append(valid.astype(np.float32).reshape(1, H * W))
    return jnp.asarray(np.stack(masks, axis=0))


def sam_s_forward(x, x_img, w1, w2, w3):
    """Pallas implementation of SAM_S.forward (bias=False, norm=None)."""
    N, n_feat, H, W = x.shape
    K = w1.shape[-1]
    HW = H * W
    halo = (K // 2) * W + (K // 2)
    pad = ((halo + 127) // 128) * 128          # lane-aligned halo in scratch

    xf = x.reshape(N, n_feat, HW)
    ximgf = x_img.reshape(N, 3, HW)
    w1r = _repack_weights(w1, K)               # (K*K, n_feat, n_feat)
    w2r = _repack_weights(w2, K)               # (K*K, 3, n_feat)
    w3r = _repack_weights(w3, K)               # (K*K, n_feat, 3)
    masks = _tap_masks(H, W, K)                # (K*K, 1, HW)

    kernel = functools.partial(
        sam_s_kernel, n_feat=n_feat, K=K, H=H, W=W, pad=pad)

    flops = int(2 * N * HW * K * K * (n_feat * n_feat + 2 * 3 * n_feat)
                + 6 * N * n_feat * HW)
    bytes_accessed = int(4 * (xf.size + ximgf.size + xf.size + ximgf.size
                              + w1r.size + w2r.size + w3r.size + masks.size))

    x1f, imgf = pl.pallas_call(
        kernel,
        out_shape=(jax.ShapeDtypeStruct((N, n_feat, HW), x.dtype),
                   jax.ShapeDtypeStruct((N, 3, HW), x.dtype)),
        grid=(N,),
        in_specs=[
            pl.BlockSpec((1, n_feat, HW), lambda n: (n, 0, 0)),
            pl.BlockSpec((1, 3, HW), lambda n: (n, 0, 0)),
            pl.BlockSpec((K * K, n_feat, n_feat), lambda n: (0, 0, 0)),
            pl.BlockSpec((K * K, 3, n_feat), lambda n: (0, 0, 0)),
            pl.BlockSpec((K * K, n_feat, 3), lambda n: (0, 0, 0)),
            pl.BlockSpec((K * K, 1, HW), lambda n: (0, 0, 0)),
        ],
        out_specs=(
            pl.BlockSpec((1, n_feat, HW), lambda n: (n, 0, 0)),
            pl.BlockSpec((1, 3, HW), lambda n: (n, 0, 0)),
        ),
        scratch_shapes=[
            pltpu.VMEM((n_feat, HW + 2 * pad), jnp.float32),
            pltpu.VMEM((3, HW + 2 * pad), jnp.float32),
        ],
        compiler_params=pltpu.CompilerParams(
            dimension_semantics=("parallel",)),
        cost_estimate=pl.CostEstimate(
            flops=flops,
            transcendentals=int(N * n_feat * HW),
            bytes_accessed=bytes_accessed),
    )(xf, ximgf, w1r, w2r, w3r, masks)

    return x1f.reshape(N, n_feat, H, W), imgf.reshape(N, 3, H, W)


# ---------------- pure-JAX reference (for correctness check) ----------------

def _conv_ref(x, w):
    return jax.lax.conv_general_dilated(
        x, w, window_strides=(1, 1), padding="SAME",
        dimension_numbers=("NCHW", "OIHW", "NCHW"),
        precision=jax.lax.Precision.HIGHEST)


def sam_s_reference(x, x_img, w1, w2, w3):
    x1 = _conv_ref(x, w1)
    img = _conv_ref(x, w2) + x_img
    x2 = jax.nn.sigmoid(_conv_ref(img, w3))
    return x1 * x2 + x, img


if __name__ == "__main__":
    n_feat, K = 4, 3
    N, H, W = 2, 16, 16

    key = jax.random.PRNGKey(0)
    kx, ki, k1, k2, k3 = jax.random.split(key, 5)
    x = jax.random.normal(kx, (N, n_feat, H, W), jnp.float32)
    x_img = jax.random.normal(ki, (N, 3, H, W), jnp.float32)
    # Deterministic synthetic parameters (bias=False):
    w1 = 0.1 * jax.random.normal(k1, (n_feat, n_feat, K, K), jnp.float32)  # conv1
    w2 = 0.1 * jax.random.normal(k2, (3, n_feat, K, K), jnp.float32)       # conv2
    w3 = 0.1 * jax.random.normal(k3, (n_feat, 3, K, K), jnp.float32)       # conv3

    x1, img = jax.block_until_ready(sam_s_forward(x, x_img, w1, w2, w3))

    x1_ref, img_ref = sam_s_reference(x, x_img, w1, w2, w3)
    assert np.allclose(np.asarray(img), np.asarray(img_ref), atol=2e-3, rtol=2e-3)
    assert np.allclose(np.asarray(x1), np.asarray(x1_ref), atol=2e-3, rtol=2e-3)
    print("KERNEL_OK")
</pallas_src>

<mosaic_0001>
module attributes {stable_mosaic.version = 11 : i64} {
  func.func @sam_s_kernel(%arg0: i32, %arg1: memref<1x4x256xf32, #tpu.memory_space<vmem>>, %arg2: memref<1x3x256xf32, #tpu.memory_space<vmem>>, %arg3: memref<9x4x4xf32, #tpu.memory_space<vmem>>, %arg4: memref<9x3x4xf32, #tpu.memory_space<vmem>>, %arg5: memref<9x4x3xf32, #tpu.memory_space<vmem>>, %arg6: memref<9x1x256xf32, #tpu.memory_space<vmem>>, %arg7: memref<1x4x256xf32, #tpu.memory_space<vmem>>, %arg8: memref<1x3x256xf32, #tpu.memory_space<vmem>>, %arg9: memref<4x512xf32, #tpu.memory_space<vmem>>, %arg10: memref<3x512xf32, #tpu.memory_space<vmem>>) attributes {dimension_semantics = [#tpu.dimension_semantics<parallel>], iteration_bounds = array<i64: 2>, scalar_prefetch = 0 : i64, scratch_operands = 2 : i64, tpu.core_type = #tpu.core_type<tc>, window_params = [{transform_indices = @transform_0, window_bounds = array<i64: 1, 4, 256>}, {transform_indices = @transform_1, window_bounds = array<i64: 1, 3, 256>}, {pipeline_mode = #tpu.pipeline_mode<synchronous>, transform_indices = @transform_2, window_bounds = array<i64: 9, 4, 4>}, {pipeline_mode = #tpu.pipeline_mode<synchronous>, transform_indices = @transform_3, window_bounds = array<i64: 9, 3, 4>}, {pipeline_mode = #tpu.pipeline_mode<synchronous>, transform_indices = @transform_4, window_bounds = array<i64: 9, 4, 3>}, {pipeline_mode = #tpu.pipeline_mode<synchronous>, transform_indices = @transform_5, window_bounds = array<i64: 9, 1, 256>}, {transform_indices = @transform_6, window_bounds = array<i64: 1, 4, 256>}, {transform_indices = @transform_7, window_bounds = array<i64: 1, 3, 256>}]} {
    %cst = arith.constant 0.000000e+00 : f32
    %0 = vector.broadcast %cst : f32 to vector<4x512xf32>
    %c0 = arith.constant 0 : index
    %c0_0 = arith.constant 0 : index
    %1 = vector.load %arg9[%c0, %c0_0] : memref<4x512xf32, #tpu.memory_space<vmem>>, vector<4x512xf32>
    tpu.vector_store %arg9[%c0, %c0_0], %0 {strides = array<i32>} : memref<4x512xf32, #tpu.memory_space<vmem>>, vector<4x512xf32>,
    %c0_1 = arith.constant 0 : index
    %c0_2 = arith.constant 0 : index
    %c0_3 = arith.constant 0 : index
    %2 = vector.load %arg1[%c0_1, %c0_2, %c0_3] : memref<1x4x256xf32, #tpu.memory_space<vmem>>, vector<1x4x256xf32>
    %3 = vector.shape_cast %2 : vector<1x4x256xf32> to vector<4x256xf32>
    %c0_4 = arith.constant 0 : index
    %c128 = arith.constant 128 : index
    %4 = vector.load %arg9[%c0_4, %c128] : memref<4x512xf32, #tpu.memory_space<vmem>>, vector<4x256xf32>
    tpu.vector_store %arg9[%c0_4, %c128], %3 {strides = array<i32>} : memref<4x512xf32, #tpu.memory_space<vmem>>, vector<4x256xf32>,
    %cst_5 = arith.constant 0.000000e+00 : f32
    %5 = vector.broadcast %cst_5 : f32 to vector<4x256xf32>
    %cst_6 = arith.constant 0.000000e+00 : f32
    %6 = vector.broadcast %cst_6 : f32 to vector<3x256xf32>
    %c0_7 = arith.constant 0 : index
    %c111 = arith.constant 111 : index
    %7 = vector.load %arg9[%c0_7, %c111] : memref<4x512xf32, #tpu.memory_space<vmem>>, vector<4x256xf32>
    %c0_8 = arith.constant 0 : index
    %c0_9 = arith.constant 0 : index
    %c0_10 = arith.constant 0 : index
    %8 = vector.load %arg6[%c0_8, %c0_9, %c0_10] : memref<9x1x256xf32, #tpu.memory_space<vmem>>, vector<1x1x256xf32>
    %9 = vector.shape_cast %8 : vector<1x1x256xf32> to vector<1x256xf32>
    %10 = vector.broadcast %9 : vector<1x256xf32> to vector<4x256xf32>
    %11 = arith.mulf %7, %10 : vector<4x256xf32>
    %c0_11 = arith.constant 0 : index
    %c0_12 = arith.constant 0 : index
    %c0_13 = arith.constant 0 : index
    %12 = vector.load %arg3[%c0_11, %c0_12, %c0_13] : memref<9x4x4xf32, #tpu.memory_space<vmem>>, vector<1x4x4xf32>
    %13 = vector.shape_cast %12 : vector<1x4x4xf32> to vector<4x4xf32>
    %cst_14 = arith.constant dense<0.000000e+00> : vector<4x256xf32>
    %14 = tpu.matmul %13, %11, %cst_14 {dimension_numbers = #tpu.dot_dimension_numbers<[1], [0], [0], [1], [0, 0, 1, 1], [], []>} : vector<4x4xf32>, vector<4x256xf32>, vector<4x256xf32> -> vector<4x256xf32>
    %15 = arith.addf %5, %14 : vector<4x256xf32>
    %c0_15 = arith.constant 0 : index
    %c0_16 = arith.constant 0 : index
    %c0_17 = arith.constant 0 : index
    %16 = vector.load %arg4[%c0_15, %c0_16, %c0_17] : memref<9x3x4xf32, #tpu.memory_space<vmem>>, vector<1x3x4xf32>
    %17 = vector.shape_cast %16 : vector<1x3x4xf32> to vector<3x4xf32>
    %cst_18 = arith.constant dense<0.000000e+00> : vector<3x256xf32>
    %18 = tpu.matmul %17, %11, %cst_18 {dimension_numbers = #tpu.dot_dimension_numbers<[1], [0], [0], [1], [0, 0, 1, 1], [], []>} : vector<3x4xf32>, vector<4x256xf32>, vector<3x256xf32> -> vector<3x256xf32>
    %19 = arith.addf %6, %18 : vector<3x256xf32>
    %c0_19 = arith.constant 0 : index
    %c112 = arith.constant 112 : index
    %20 = vector.load %arg9[%c0_19, %c112] : memref<4x512xf32, #tpu.memory_space<vmem>>, vector<4x256xf32>
    %c1 = arith.constant 1 : index
    %c0_20 = arith.constant 0 : index
    %c0_21 = arith.constant 0 : index
    %21 = vector.load %arg6[%c1, %c0_20, %c0_21] : memref<9x1x256xf32, #tpu.memory_space<vmem>>, vector<1x1x256xf32>
    %22 = vector.shape_cast %21 : vector<1x1x256xf32> to vector<1x256xf32>
    %23 = vector.broadcast %22 : vector<1x256xf32> to vector<4x256xf32>
    %24 = arith.mulf %20, %23 : vector<4x256xf32>
    %c1_22 = arith.constant 1 : index
    %c0_23 = arith.constant 0 : index
    %c0_24 = arith.constant 0 : index
    %25 = vector.load %arg3[%c1_22, %c0_23, %c0_24] : memref<9x4x4xf32, #tpu.memory_space<vmem>>, vector<1x4x4xf32>
    %26 = vector.shape_cast %25 : vector<1x4x4xf32> to vector<4x4xf32>
    %cst_25 = arith.constant dense<0.000000e+00> : vector<4x256xf32>
    %27 = tpu.matmul %26, %24, %cst_25 {dimension_numbers = #tpu.dot_dimension_numbers<[1], [0], [0], [1], [0, 0, 1, 1], [], []>} : vector<4x4xf32>, vector<4x256xf32>, vector<4x256xf32> -> vector<4x256xf32>
    %28 = arith.addf %15, %27 : vector<4x256xf32>
    %c1_26 = arith.constant 1 : index
    %c0_27 = arith.constant 0 : index
    %c0_28 = arith.constant 0 : index
    %29 = vector.load %arg4[%c1_26, %c0_27, %c0_28] : memref<9x3x4xf32, #tpu.memory_space<vmem>>, vector<1x3x4xf32>
    %30 = vector.shape_cast %29 : vector<1x3x4xf32> to vector<3x4xf32>
    %cst_29 = arith.constant dense<0.000000e+00> : vector<3x256xf32>
    %31 = tpu.matmul %30, %24, %cst_29 {dimension_numbers = #tpu.dot_dimension_numbers<[1], [0], [0], [1], [0, 0, 1, 1], [], []>} : vector<3x4xf32>, vector<4x256xf32>, vector<3x256xf32> -> vector<3x256xf32>
    %32 = arith.addf %19, %31 : vector<3x256xf32>
    %c0_30 = arith.constant 0 : index
    %c113 = arith.constant 113 : index
    %33 = vector.load %arg9[%c0_30, %c113] : memref<4x512xf32, #tpu.memory_space<vmem>>, vector<4x256xf32>
    %c2 = arith.constant 2 : index
    %c0_31 = arith.constant 0 : index
    %c0_32 = arith.constant 0 : index
    %34 = vector.load %arg6[%c2, %c0_31, %c0_32] : memref<9x1x256xf32, #tpu.memory_space<vmem>>, vector<1x1x256xf32>
    %35 = vector.shape_cast %34 : vector<1x1x256xf32> to vector<1x256xf32>
    %36 = vector.broadcast %35 : vector<1x256xf32> to vector<4x256xf32>
    %37 = arith.mulf %33, %36 : vector<4x256xf32>
    %c2_33 = arith.constant 2 : index
    %c0_34 = arith.constant 0 : index
    %c0_35 = arith.constant 0 : index
    %38 = vector.load %arg3[%c2_33, %c0_34, %c0_35] : memref<9x4x4xf32, #tpu.memory_space<vmem>>, vector<1x4x4xf32>
    %39 = vector.shape_cast %38 : vector<1x4x4xf32> to vector<4x4xf32>
    %cst_36 = arith.constant dense<0.000000e+00> : vector<4x256xf32>
    %40 = tpu.matmul %39, %37, %cst_36 {dimension_numbers = #tpu.dot_dimension_numbers<[1], [0], [0], [1], [0, 0, 1, 1], [], []>} : vector<4x4xf32>, vector<4x256xf32>, vector<4x256xf32> -> vector<4x256xf32>
    %41 = arith.addf %28, %40 : vector<4x256xf32>
    %c2_37 = arith.constant 2 : index
    %c0_38 = arith.constant 0 : index
    %c0_39 = arith.constant 0 : index
    %42 = vector.load %arg4[%c2_37, %c0_38, %c0_39] : memref<9x3x4xf32, #tpu.memory_space<vmem>>, vector<1x3x4xf32>
    %43 = vector.shape_cast %42 : vector<1x3x4xf32> to vector<3x4xf32>
    %cst_40 = arith.constant dense<0.000000e+00> : vector<3x256xf32>
    %44 = tpu.matmul %43, %37, %cst_40 {dimension_numbers = #tpu.dot_dimension_numbers<[1], [0], [0], [1], [0, 0, 1, 1], [], []>} : vector<3x4xf32>, vector<4x256xf32>, vector<3x256xf32> -> vector<3x256xf32>
    %45 = arith.addf %32, %44 : vector<3x256xf32>
    %c0_41 = arith.constant 0 : index
    %c127 = arith.constant 127 : index
    %46 = vector.load %arg9[%c0_41, %c127] : memref<4x512xf32, #tpu.memory_space<vmem>>, vector<4x256xf32>
    %c3 = arith.constant 3 : index
    %c0_42 = arith.constant 0 : index
    %c0_43 = arith.constant 0 : index
    %47 = vector.load %arg6[%c3, %c0_42, %c0_43] : memref<9x1x256xf32, #tpu.memory_space<vmem>>, vector<1x1x256xf32>
    %48 = vector.shape_cast %47 : vector<1x1x256xf32> to vector<1x256xf32>
    %49 = vector.broadcast %48 : vector<1x256xf32> to vector<4x256xf32>
    %50 = arith.mulf %46, %49 : vector<4x256xf32>
    %c3_44 = arith.constant 3 : index
    %c0_45 = arith.constant 0 : index
    %c0_46 = arith.constant 0 : index
    %51 = vector.load %arg3[%c3_44, %c0_45, %c0_46] : memref<9x4x4xf32, #tpu.memory_space<vmem>>, vector<1x4x4xf32>
    %52 = vector.shape_cast %51 : vector<1x4x4xf32> to vector<4x4xf32>
    %cst_47 = arith.constant dense<0.000000e+00> : vector<4x256xf32>
    %53 = tpu.matmul %52, %50, %cst_47 {dimension_numbers = #tpu.dot_dimension_numbers<[1], [0], [0], [1], [0, 0, 1, 1], [], []>} : vector<4x4xf32>, vector<4x256xf32>, vector<4x256xf32> -> vector<4x256xf32>
    %54 = arith.addf %41, %53 : vector<4x256xf32>
    %c3_48 = arith.constant 3 : index
    %c0_49 = arith.constant 0 : index
    %c0_50 = arith.constant 0 : index
    %55 = vector.load %arg4[%c3_48, %c0_49, %c0_50] : memref<9x3x4xf32, #tpu.memory_space<vmem>>, vector<1x3x4xf32>
    %56 = vector.shape_cast %55 : vector<1x3x4xf32> to vector<3x4xf32>
    %cst_51 = arith.constant dense<0.000000e+00> : vector<3x256xf32>
    %57 = tpu.matmul %56, %50, %cst_51 {dimension_numbers = #tpu.dot_dimension_numbers<[1], [0], [0], [1], [0, 0, 1, 1], [], []>} : vector<3x4xf32>, vector<4x256xf32>, vector<3x256xf32> -> vector<3x256xf32>
    %58 = arith.addf %45, %57 : vector<3x256xf32>
    %c0_52 = arith.constant 0 : index
    %c128_53 = arith.constant 128 : index
    %59 = vector.load %arg9[%c0_52, %c128_53] : memref<4x512xf32, #tpu.memory_space<vmem>>, vector<4x256xf32>
    %c4 = arith.constant 4 : index
    %c0_54 = arith.constant 0 : index
    %c0_55 = arith.constant 0 : index
    %60 = vector.load %arg6[%c4, %c0_54, %c0_55] : memref<9x1x256xf32, #tpu.memory_space<vmem>>, vector<1x1x256xf32>
    %61 = vector.shape_cast %60 : vector<1x1x256xf32> to vector<1x256xf32>
    %62 = vector.broadcast %61 : vector<1x256xf32> to vector<4x256xf32>
    %63 = arith.mulf %59, %62 : vector<4x256xf32>
    %c4_56 = arith.constant 4 : index
    %c0_57 = arith.constant 0 : index
    %c0_58 = arith.constant 0 : index
    %64 = vector.load %arg3[%c4_56, %c0_57, %c0_58] : memref<9x4x4xf32, #tpu.memory_space<vmem>>, vector<1x4x4xf32>
    %65 = vector.shape_cast %64 : vector<1x4x4xf32> to vector<4x4xf32>
    %cst_59 = arith.constant dense<0.000000e+00> : vector<4x256xf32>
    %66 = tpu.matmul %65, %63, %cst_59 {dimension_numbers = #tpu.dot_dimension_numbers<[1], [0], [0], [1], [0, 0, 1, 1], [], []>} : vector<4x4xf32>, vector<4x256xf32>, vector<4x256xf32> -> vector<4x256xf32>
    %67 = arith.addf %54, %66 : vector<4x256xf32>
    %c4_60 = arith.constant 4 : index
    %c0_61 = arith.constant 0 : index
    %c0_62 = arith.constant 0 : index
    %68 = vector.load %arg4[%c4_60, %c0_61, %c0_62] : memref<9x3x4xf32, #tpu.memory_space<vmem>>, vector<1x3x4xf32>
    %69 = vector.shape_cast %68 : vector<1x3x4xf32> to vector<3x4xf32>
    %cst_63 = arith.constant dense<0.000000e+00> : vector<3x256xf32>
    %70 = tpu.matmul %69, %63, %cst_63 {dimension_numbers = #tpu.dot_dimension_numbers<[1], [0], [0], [1], [0, 0, 1, 1], [], []>} : vector<3x4xf32>, vector<4x256xf32>, vector<3x256xf32> -> vector<3x256xf32>
    %71 = arith.addf %58, %70 : vector<3x256xf32>
    %c0_64 = arith.constant 0 : index
    %c129 = arith.constant 129 : index
    %72 = vector.load %arg9[%c0_64, %c129] : memref<4x512xf32, #tpu.memory_space<vmem>>, vector<4x256xf32>
    %c5 = arith.constant 5 : index
    %c0_65 = arith.constant 0 : index
    %c0_66 = arith.constant 0 : index
    %73 = vector.load %arg6[%c5, %c0_65, %c0_66] : memref<9x1x256xf32, #tpu.memory_space<vmem>>, vector<1x1x256xf32>
    %74 = vector.shape_cast %73 : vector<1x1x256xf32> to vector<1x256xf32>
    %75 = vector.broadcast %74 : vector<1x256xf32> to vector<4x256xf32>
    %76 = arith.mulf %72, %75 : vector<4x256xf32>
    %c5_67 = arith.constant 5 : index
    %c0_68 = arith.constant 0 : index
    %c0_69 = arith.constant 0 : index
    %77 = vector.load %arg3[%c5_67, %c0_68, %c0_69] : memref<9x4x4xf32, #tpu.memory_space<vmem>>, vector<1x4x4xf32>
    %78 = vector.shape_cast %77 : vector<1x4x4xf32> to vector<4x4xf32>
    %cst_70 = arith.constant dense<0.000000e+00> : vector<4x256xf32>
    %79 = tpu.matmul %78, %76, %cst_70 {dimension_numbers = #tpu.dot_dimension_numbers<[1], [0], [0], [1], [0, 0, 1, 1], [], []>} : vector<4x4xf32>, vector<4x256xf32>, vector<4x256xf32> -> vector<4x256xf32>
    %80 = arith.addf %67, %79 : vector<4x256xf32>
    %c5_71 = arith.constant 5 : index
    %c0_72 = arith.constant 0 : index
    %c0_73 = arith.constant 0 : index
    %81 = vector.load %arg4[%c5_71, %c0_72, %c0_73] : memref<9x3x4xf32, #tpu.memory_space<vmem>>, vector<1x3x4xf32>
    %82 = vector.shape_cast %81 : vector<1x3x4xf32> to vector<3x4xf32>
    %cst_74 = arith.constant dense<0.000000e+00> : vector<3x256xf32>
    %83 = tpu.matmul %82, %76, %cst_74 {dimension_numbers = #tpu.dot_dimension_numbers<[1], [0], [0], [1], [0, 0, 1, 1], [], []>} : vector<3x4xf32>, vector<4x256xf32>, vector<3x256xf32> -> vector<3x256xf32>
    %84 = arith.addf %71, %83 : vector<3x256xf32>
    %c0_75 = arith.constant 0 : index
    %c143 = arith.constant 143 : index
    %85 = vector.load %arg9[%c0_75, %c143] : memref<4x512xf32, #tpu.memory_space<vmem>>, vector<4x256xf32>
    %c6 = arith.constant 6 : index
    %c0_76 = arith.constant 0 : index
    %c0_77 = arith.constant 0 : index
    %86 = vector.load %arg6[%c6, %c0_76, %c0_77] : memref<9x1x256xf32, #tpu.memory_space<vmem>>, vector<1x1x256xf32>
    %87 = vector.shape_cast %86 : vector<1x1x256xf32> to vector<1x256xf32>
    %88 = vector.broadcast %87 : vector<1x256xf32> to vector<4x256xf32>
    %89 = arith.mulf %85, %88 : vector<4x256xf32>
    %c6_78 = arith.constant 6 : index
    %c0_79 = arith.constant 0 : index
    %c0_80 = arith.constant 0 : index
    %90 = vector.load %arg3[%c6_78, %c0_79, %c0_80] : memref<9x4x4xf32, #tpu.memory_space<vmem>>, vector<1x4x4xf32>
    %91 = vector.shape_cast %90 : vector<1x4x4xf32> to vector<4x4xf32>
    %cst_81 = arith.constant dense<0.000000e+00> : vector<4x256xf32>
    %92 = tpu.matmul %91, %89, %cst_81 {dimension_numbers = #tpu.dot_dimension_numbers<[1], [0], [0], [1], [0, 0, 1, 1], [], []>} : vector<4x4xf32>, vector<4x256xf32>, vector<4x256xf32> -> vector<4x256xf32>
    %93 = arith.addf %80, %92 : vector<4x256xf32>
    %c6_82 = arith.constant 6 : index
    %c0_83 = arith.constant 0 : index
    %c0_84 = arith.constant 0 : index
    %94 = vector.load %arg4[%c6_82, %c0_83, %c0_84] : memref<9x3x4xf32, #tpu.memory_space<vmem>>, vector<1x3x4xf32>
    %95 = vector.shape_cast %94 : vector<1x3x4xf32> to vector<3x4xf32>
    %cst_85 = arith.constant dense<0.000000e+00> : vector<3x256xf32>
    %96 = tpu.matmul %95, %89, %cst_85 {dimension_numbers = #tpu.dot_dimension_numbers<[1], [0], [0], [1], [0, 0, 1, 1], [], []>} : vector<3x4xf32>, vector<4x256xf32>, vector<3x256xf32> -> vector<3x256xf32>
    %97 = arith.addf %84, %96 : vector<3x256xf32>
    %c0_86 = arith.constant 0 : index
    %c144 = arith.constant 144 : index
    %98 = vector.load %arg9[%c0_86, %c144] : memref<4x512xf32, #tpu.memory_space<vmem>>, vector<4x256xf32>
    %c7 = arith.constant 7 : index
    %c0_87 = arith.constant 0 : index
    %c0_88 = arith.constant 0 : index
    %99 = vector.load %arg6[%c7, %c0_87, %c0_88] : memref<9x1x256xf32, #tpu.memory_space<vmem>>, vector<1x1x256xf32>
    %100 = vector.shape_cast %99 : vector<1x1x256xf32> to vector<1x256xf32>
    %101 = vector.broadcast %100 : vector<1x256xf32> to vector<4x256xf32>
    %102 = arith.mulf %98, %101 : vector<4x256xf32>
    %c7_89 = arith.constant 7 : index
    %c0_90 = arith.constant 0 : index
    %c0_91 = arith.constant 0 : index
    %103 = vector.load %arg3[%c7_89, %c0_90, %c0_91] : memref<9x4x4xf32, #tpu.memory_space<vmem>>, vector<1x4x4xf32>
    %104 = vector.shape_cast %103 : vector<1x4x4xf32> to vector<4x4xf32>
    %cst_92 = arith.constant dense<0.000000e+00> : vector<4x256xf32>
    %105 = tpu.matmul %104, %102, %cst_92 {dimension_numbers = #tpu.dot_dimension_numbers<[1], [0], [0], [1], [0, 0, 1, 1], [], []>} : vector<4x4xf32>, vector<4x256xf32>, vector<4x256xf32> -> vector<4x256xf32>
    %106 = arith.addf %93, %105 : vector<4x256xf32>
    %c7_93 = arith.constant 7 : index
    %c0_94 = arith.constant 0 : index
    %c0_95 = arith.constant 0 : index
    %107 = vector.load %arg4[%c7_93, %c0_94, %c0_95] : memref<9x3x4xf32, #tpu.memory_space<vmem>>, vector<1x3x4xf32>
    %108 = vector.shape_cast %107 : vector<1x3x4xf32> to vector<3x4xf32>
    %cst_96 = arith.constant dense<0.000000e+00> : vector<3x256xf32>
    %109 = tpu.matmul %108, %102, %cst_96 {dimension_numbers = #tpu.dot_dimension_numbers<[1], [0], [0], [1], [0, 0, 1, 1], [], []>} : vector<3x4xf32>, vector<4x256xf32>, vector<3x256xf32> -> vector<3x256xf32>
    %110 = arith.addf %97, %109 : vector<3x256xf32>
    %c0_97 = arith.constant 0 : index
    %c145 = arith.constant 145 : index
    %111 = vector.load %arg9[%c0_97, %c145] : memref<4x512xf32, #tpu.memory_space<vmem>>, vector<4x256xf32>
    %c8 = arith.constant 8 : index
    %c0_98 = arith.constant 0 : index
    %c0_99 = arith.constant 0 : index
    %112 = vector.load %arg6[%c8, %c0_98, %c0_99] : memref<9x1x256xf32, #tpu.memory_space<vmem>>, vector<1x1x256xf32>
    %113 = vector.shape_cast %112 : vector<1x1x256xf32> to vector<1x256xf32>
    %114 = vector.broadcast %113 : vector<1x256xf32> to vector<4x256xf32>
    %115 = arith.mulf %111, %114 : vector<4x256xf32>
    %c8_100 = arith.constant 8 : index
    %c0_101 = arith.constant 0 : index
    %c0_102 = arith.constant 0 : index
    %116 = vector.load %arg3[%c8_100, %c0_101, %c0_102] : memref<9x4x4xf32, #tpu.memory_space<vmem>>, vector<1x4x4xf32>
    %117 = vector.shape_cast %116 : vector<1x4x4xf32> to vector<4x4xf32>
    %cst_103 = arith.constant dense<0.000000e+00> : vector<4x256xf32>
    %118 = tpu.matmul %117, %115, %cst_103 {dimension_numbers = #tpu.dot_dimension_numbers<[1], [0], [0], [1], [0, 0, 1, 1], [], []>} : vector<4x4xf32>, vector<4x256xf32>, vector<4x256xf32> -> vector<4x256xf32>
    %119 = arith.addf %106, %118 : vector<4x256xf32>
    %c8_104 = arith.constant 8 : index
    %c0_105 = arith.constant 0 : index
    %c0_106 = arith.constant 0 : index
    %120 = vector.load %arg4[%c8_104, %c0_105, %c0_106] : memref<9x3x4xf32, #tpu.memory_space<vmem>>, vector<1x3x4xf32>
    %121 = vector.shape_cast %120 : vector<1x3x4xf32> to vector<3x4xf32>
    %cst_107 = arith.constant dense<0.000000e+00> : vector<3x256xf32>
    %122 = tpu.matmul %121, %115, %cst_107 {dimension_numbers = #tpu.dot_dimension_numbers<[1], [0], [0], [1], [0, 0, 1, 1], [], []>} : vector<3x4xf32>, vector<4x256xf32>, vector<3x256xf32> -> vector<3x256xf32>
    %123 = arith.addf %110, %122 : vector<3x256xf32>
    %c0_108 = arith.constant 0 : index
    %c0_109 = arith.constant 0 : index
    %c0_110 = arith.constant 0 : index
    %124 = vector.load %arg2[%c0_108, %c0_109, %c0_110] : memref<1x3x256xf32, #tpu.memory_space<vmem>>, vector<1x3x256xf32>
    %125 = vector.shape_cast %124 : vector<1x3x256xf32> to vector<3x256xf32>
    %126 = arith.addf %123, %125 : vector<3x256xf32>
    %c0_111 = arith.constant 0 : index
    %c0_112 = arith.constant 0 : index
    %c0_113 = arith.constant 0 : index
    %127 = vector.load %arg8[%c0_111, %c0_112, %c0_113] : memref<1x3x256xf32, #tpu.memory_space<vmem>>, vector<1x3x256xf32>
    %128 = vector.shape_cast %127 : vector<1x3x256xf32> to vector<3x256xf32>
    %129 = vector.shape_cast %126 : vector<3x256xf32> to vector<1x3x256xf32>
    tpu.vector_store %arg8[%c0_111, %c0_112, %c0_113], %129 {strides = array<i32>} : memref<1x3x256xf32, #tpu.memory_space<vmem>>, vector<1x3x256xf32>,
    %cst_114 = arith.constant 0.000000e+00 : f32
    %130 = vector.broadcast %cst_114 : f32 to vector<3x512xf32>
    %c0_115 = arith.constant 0 : index
    %c0_116 = arith.constant 0 : index
    %131 = vector.load %arg10[%c0_115, %c0_116] : memref<3x512xf32, #tpu.memory_space<vmem>>, vector<3x512xf32>
    tpu.vector_store %arg10[%c0_115, %c0_116], %130 {strides = array<i32>} : memref<3x512xf32, #tpu.memory_space<vmem>>, vector<3x512xf32>,
    %c0_117 = arith.constant 0 : index
    %c128_118 = arith.constant 128 : index
    %132 = vector.load %arg10[%c0_117, %c128_118] : memref<3x512xf32, #tpu.memory_space<vmem>>, vector<3x256xf32>
    tpu.vector_store %arg10[%c0_117, %c128_118], %126 {strides = array<i32>} : memref<3x512xf32, #tpu.memory_space<vmem>>, vector<3x256xf32>,
    %cst_119 = arith.constant 0.000000e+00 : f32
    %133 = vector.broadcast %cst_119 : f32 to vector<4x256xf32>
    %c0_120 = arith.constant 0 : index
    %c111_121 = arith.constant 111 : index
    %134 = vector.load %arg10[%c0_120, %c111_121] : memref<3x512xf32, #tpu.memory_space<vmem>>, vector<3x256xf32>
    %c0_122 = arith.constant 0 : index
    %c0_123 = arith.constant 0 : index
    %c0_124 = arith.constant 0 : index
    %135 = vector.load %arg6[%c0_122, %c0_123, %c0_124] : memref<9x1x256xf32, #tpu.memory_space<vmem>>, vector<1x1x256xf32>
    %136 = vector.shape_cast %135 : vector<1x1x256xf32> to vector<1x256xf32>
    %137 = vector.broadcast %136 : vector<1x256xf32> to vector<3x256xf32>
    %138 = arith.mulf %134, %137 : vector<3x256xf32>
    %c0_125 = arith.constant 0 : index
    %c0_126 = arith.constant 0 : index
    %c0_127 = arith.constant 0 : index
    %139 = vector.load %arg5[%c0_125, %c0_126, %c0_127] : memref<9x4x3xf32, #tpu.memory_space<vmem>>, vector<1x4x3xf32>
    %140 = vector.shape_cast %139 : vector<1x4x3xf32> to vector<4x3xf32>
    %cst_128 = arith.constant dense<0.000000e+00> : vector<4x256xf32>
    %141 = tpu.matmul %140, %138, %cst_128 {dimension_numbers = #tpu.dot_dimension_numbers<[1], [0], [0], [1], [0, 0, 1, 1], [], []>} : vector<4x3xf32>, vector<3x256xf32>, vector<4x256xf32> -> vector<4x256xf32>
    %142 = arith.addf %133, %141 : vector<4x256xf32>
    %c0_129 = arith.constant 0 : index
    %c112_130 = arith.constant 112 : index
    %143 = vector.load %arg10[%c0_129, %c112_130] : memref<3x512xf32, #tpu.memory_space<vmem>>, vector<3x256xf32>
    %c1_131 = arith.constant 1 : index
    %c0_132 = arith.constant 0 : index
    %c0_133 = arith.constant 0 : index
    %144 = vector.load %arg6[%c1_131, %c0_132, %c0_133] : memref<9x1x256xf32, #tpu.memory_space<vmem>>, vector<1x1x256xf32>
    %145 = vector.shape_cast %144 : vector<1x1x256xf32> to vector<1x256xf32>
    %146 = vector.broadcast %145 : vector<1x256xf32> to vector<3x256xf32>
    %147 = arith.mulf %143, %146 : vector<3x256xf32>
    %c1_134 = arith.constant 1 : index
    %c0_135 = arith.constant 0 : index
    %c0_136 = arith.constant 0 : index
    %148 = vector.load %arg5[%c1_134, %c0_135, %c0_136] : memref<9x4x3xf32, #tpu.memory_space<vmem>>, vector<1x4x3xf32>
    %149 = vector.shape_cast %148 : vector<1x4x3xf32> to vector<4x3xf32>
    %cst_137 = arith.constant dense<0.000000e+00> : vector<4x256xf32>
    %150 = tpu.matmul %149, %147, %cst_137 {dimension_numbers = #tpu.dot_dimension_numbers<[1], [0], [0], [1], [0, 0, 1, 1], [], []>} : vector<4x3xf32>, vector<3x256xf32>, vector<4x256xf32> -> vector<4x256xf32>
    %151 = arith.addf %142, %150 : vector<4x256xf32>
    %c0_138 = arith.constant 0 : index
    %c113_139 = arith.constant 113 : index
    %152 = vector.load %arg10[%c0_138, %c113_139] : memref<3x512xf32, #tpu.memory_space<vmem>>, vector<3x256xf32>
    %c2_140 = arith.constant 2 : index
    %c0_141 = arith.constant 0 : index
    %c0_142 = arith.constant 0 : index
    %153 = vector.load %arg6[%c2_140, %c0_141, %c0_142] : memref<9x1x256xf32, #tpu.memory_space<vmem>>, vector<1x1x256xf32>
    %154 = vector.shape_cast %153 : vector<1x1x256xf32> to vector<1x256xf32>
    %155 = vector.broadcast %154 : vector<1x256xf32> to vector<3x256xf32>
    %156 = arith.mulf %152, %155 : vector<3x256xf32>
    %c2_143 = arith.constant 2 : index
    %c0_144 = arith.constant 0 : index
    %c0_145 = arith.constant 0 : index
    %157 = vector.load %arg5[%c2_143, %c0_144, %c0_145] : memref<9x4x3xf32, #tpu.memory_space<vmem>>, vector<1x4x3xf32>
    %158 = vector.shape_cast %157 : vector<1x4x3xf32> to vector<4x3xf32>
    %cst_146 = arith.constant dense<0.000000e+00> : vector<4x256xf32>
    %159 = tpu.matmul %158, %156, %cst_146 {dimension_numbers = #tpu.dot_dimension_numbers<[1], [0], [0], [1], [0, 0, 1, 1], [], []>} : vector<4x3xf32>, vector<3x256xf32>, vector<4x256xf32> -> vector<4x256xf32>
    %160 = arith.addf %151, %159 : vector<4x256xf32>
    %c0_147 = arith.constant 0 : index
    %c127_148 = arith.constant 127 : index
    %161 = vector.load %arg10[%c0_147, %c127_148] : memref<3x512xf32, #tpu.memory_space<vmem>>, vector<3x256xf32>
    %c3_149 = arith.constant 3 : index
    %c0_150 = arith.constant 0 : index
    %c0_151 = arith.constant 0 : index
    %162 = vector.load %arg6[%c3_149, %c0_150, %c0_151] : memref<9x1x256xf32, #tpu.memory_space<vmem>>, vector<1x1x256xf32>
    %163 = vector.shape_cast %162 : vector<1x1x256xf32> to vector<1x256xf32>
    %164 = vector.broadcast %163 : vector<1x256xf32> to vector<3x256xf32>
    %165 = arith.mulf %161, %164 : vector<3x256xf32>
    %c3_152 = arith.constant 3 : index
    %c0_153 = arith.constant 0 : index
    %c0_154 = arith.constant 0 : index
    %166 = vector.load %arg5[%c3_152, %c0_153, %c0_154] : memref<9x4x3xf32, #tpu.memory_space<vmem>>, vector<1x4x3xf32>
    %167 = vector.shape_cast %166 : vector<1x4x3xf32> to vector<4x3xf32>
    %cst_155 = arith.constant dense<0.000000e+00> : vector<4x256xf32>
    %168 = tpu.matmul %167, %165, %cst_155 {dimension_numbers = #tpu.dot_dimension_numbers<[1], [0], [0], [1], [0, 0, 1, 1], [], []>} : vector<4x3xf32>, vector<3x256xf32>, vector<4x256xf32> -> vector<4x256xf32>
    %169 = arith.addf %160, %168 : vector<4x256xf32>
    %c0_156 = arith.constant 0 : index
    %c128_157 = arith.constant 128 : index
    %170 = vector.load %arg10[%c0_156, %c128_157] : memref<3x512xf32, #tpu.memory_space<vmem>>, vector<3x256xf32>
    %c4_158 = arith.constant 4 : index
    %c0_159 = arith.constant 0 : index
    %c0_160 = arith.constant 0 : index
    %171 = vector.load %arg6[%c4_158, %c0_159, %c0_160] : memref<9x1x256xf32, #tpu.memory_space<vmem>>, vector<1x1x256xf32>
    %172 = vector.shape_cast %171 : vector<1x1x256xf32> to vector<1x256xf32>
    %173 = vector.broadcast %172 : vector<1x256xf32> to vector<3x256xf32>
    %174 = arith.mulf %170, %173 : vector<3x256xf32>
    %c4_161 = arith.constant 4 : index
    %c0_162 = arith.constant 0 : index
    %c0_163 = arith.constant 0 : index
    %175 = vector.load %arg5[%c4_161, %c0_162, %c0_163] : memref<9x4x3xf32, #tpu.memory_space<vmem>>, vector<1x4x3xf32>
    %176 = vector.shape_cast %175 : vector<1x4x3xf32> to vector<4x3xf32>
    %cst_164 = arith.constant dense<0.000000e+00> : vector<4x256xf32>
    %177 = tpu.matmul %176, %174, %cst_164 {dimension_numbers = #tpu.dot_dimension_numbers<[1], [0], [0], [1], [0, 0, 1, 1], [], []>} : vector<4x3xf32>, vector<3x256xf32>, vector<4x256xf32> -> vector<4x256xf32>
    %178 = arith.addf %169, %177 : vector<4x256xf32>
    %c0_165 = arith.constant 0 : index
    %c129_166 = arith.constant 129 : index
    %179 = vector.load %arg10[%c0_165, %c129_166] : memref<3x512xf32, #tpu.memory_space<vmem>>, vector<3x256xf32>
    %c5_167 = arith.constant 5 : index
    %c0_168 = arith.constant 0 : index
    %c0_169 = arith.constant 0 : index
    %180 = vector.load %arg6[%c5_167, %c0_168, %c0_169] : memref<9x1x256xf32, #tpu.memory_space<vmem>>, vector<1x1x256xf32>
    %181 = vector.shape_cast %180 : vector<1x1x256xf32> to vector<1x256xf32>
    %182 = vector.broadcast %181 : vector<1x256xf32> to vector<3x256xf32>
    %183 = arith.mulf %179, %182 : vector<3x256xf32>
    %c5_170 = arith.constant 5 : index
    %c0_171 = arith.constant 0 : index
    %c0_172 = arith.constant 0 : index
    %184 = vector.load %arg5[%c5_170, %c0_171, %c0_172] : memref<9x4x3xf32, #tpu.memory_space<vmem>>, vector<1x4x3xf32>
    %185 = vector.shape_cast %184 : vector<1x4x3xf32> to vector<4x3xf32>
    %cst_173 = arith.constant dense<0.000000e+00> : vector<4x256xf32>
    %186 = tpu.matmul %185, %183, %cst_173 {dimension_numbers = #tpu.dot_dimension_numbers<[1], [0], [0], [1], [0, 0, 1, 1], [], []>} : vector<4x3xf32>, vector<3x256xf32>, vector<4x256xf32> -> vector<4x256xf32>
    %187 = arith.addf %178, %186 : vector<4x256xf32>
    %c0_174 = arith.constant 0 : index
    %c143_175 = arith.constant 143 : index
    %188 = vector.load %arg10[%c0_174, %c143_175] : memref<3x512xf32, #tpu.memory_space<vmem>>, vector<3x256xf32>
    %c6_176 = arith.constant 6 : index
    %c0_177 = arith.constant 0 : index
    %c0_178 = arith.constant 0 : index
    %189 = vector.load %arg6[%c6_176, %c0_177, %c0_178] : memref<9x1x256xf32, #tpu.memory_space<vmem>>, vector<1x1x256xf32>
    %190 = vector.shape_cast %189 : vector<1x1x256xf32> to vector<1x256xf32>
    %191 = vector.broadcast %190 : vector<1x256xf32> to vector<3x256xf32>
    %192 = arith.mulf %188, %191 : vector<3x256xf32>
    %c6_179 = arith.constant 6 : index
    %c0_180 = arith.constant 0 : index
    %c0_181 = arith.constant 0 : index
    %193 = vector.load %arg5[%c6_179, %c0_180, %c0_181] : memref<9x4x3xf32, #tpu.memory_space<vmem>>, vector<1x4x3xf32>
    %194 = vector.shape_cast %193 : vector<1x4x3xf32> to vector<4x3xf32>
    %cst_182 = arith.constant dense<0.000000e+00> : vector<4x256xf32>
    %195 = tpu.matmul %194, %192, %cst_182 {dimension_numbers = #tpu.dot_dimension_numbers<[1], [0], [0], [1], [0, 0, 1, 1], [], []>} : vector<4x3xf32>, vector<3x256xf32>, vector<4x256xf32> -> vector<4x256xf32>
    %196 = arith.addf %187, %195 : vector<4x256xf32>
    %c0_183 = arith.constant 0 : index
    %c144_184 = arith.constant 144 : index
    %197 = vector.load %arg10[%c0_183, %c144_184] : memref<3x512xf32, #tpu.memory_space<vmem>>, vector<3x256xf32>
    %c7_185 = arith.constant 7 : index
    %c0_186 = arith.constant 0 : index
    %c0_187 = arith.constant 0 : index
    %198 = vector.load %arg6[%c7_185, %c0_186, %c0_187] : memref<9x1x256xf32, #tpu.memory_space<vmem>>, vector<1x1x256xf32>
    %199 = vector.shape_cast %198 : vector<1x1x256xf32> to vector<1x256xf32>
    %200 = vector.broadcast %199 : vector<1x256xf32> to vector<3x256xf32>
    %201 = arith.mulf %197, %200 : vector<3x256xf32>
    %c7_188 = arith.constant 7 : index
    %c0_189 = arith.constant 0 : index
    %c0_190 = arith.constant 0 : index
    %202 = vector.load %arg5[%c7_188, %c0_189, %c0_190] : memref<9x4x3xf32, #tpu.memory_space<vmem>>, vector<1x4x3xf32>
    %203 = vector.shape_cast %202 : vector<1x4x3xf32> to vector<4x3xf32>
    %cst_191 = arith.constant dense<0.000000e+00> : vector<4x256xf32>
    %204 = tpu.matmul %203, %201, %cst_191 {dimension_numbers = #tpu.dot_dimension_numbers<[1], [0], [0], [1], [0, 0, 1, 1], [], []>} : vector<4x3xf32>, vector<3x256xf32>, vector<4x256xf32> -> vector<4x256xf32>
    %205 = arith.addf %196, %204 : vector<4x256xf32>
    %c0_192 = arith.constant 0 : index
    %c145_193 = arith.constant 145 : index
    %206 = vector.load %arg10[%c0_192, %c145_193] : memref<3x512xf32, #tpu.memory_space<vmem>>, vector<3x256xf32>
    %c8_194 = arith.constant 8 : index
    %c0_195 = arith.constant 0 : index
    %c0_196 = arith.constant 0 : index
    %207 = vector.load %arg6[%c8_194, %c0_195, %c0_196] : memref<9x1x256xf32, #tpu.memory_space<vmem>>, vector<1x1x256xf32>
    %208 = vector.shape_cast %207 : vector<1x1x256xf32> to vector<1x256xf32>
    %209 = vector.broadcast %208 : vector<1x256xf32> to vector<3x256xf32>
    %210 = arith.mulf %206, %209 : vector<3x256xf32>
    %c8_197 = arith.constant 8 : index
    %c0_198 = arith.constant 0 : index
    %c0_199 = arith.constant 0 : index
    %211 = vector.load %arg5[%c8_197, %c0_198, %c0_199] : memref<9x4x3xf32, #tpu.memory_space<vmem>>, vector<1x4x3xf32>
    %212 = vector.shape_cast %211 : vector<1x4x3xf32> to vector<4x3xf32>
    %cst_200 = arith.constant dense<0.000000e+00> : vector<4x256xf32>
    %213 = tpu.matmul %212, %210, %cst_200 {dimension_numbers = #tpu.dot_dimension_numbers<[1], [0], [0], [1], [0, 0, 1, 1], [], []>} : vector<4x3xf32>, vector<3x256xf32>, vector<4x256xf32> -> vector<4x256xf32>
    %214 = arith.addf %205, %213 : vector<4x256xf32>
    %215 = arith.negf %214 : vector<4x256xf32>
    %216 = math.exp %215 : vector<4x256xf32>
    %cst_201 = arith.constant 1.000000e+00 : f32
    %217 = vector.broadcast %cst_201 : f32 to vector<4x256xf32>
    %218 = arith.addf %217, %216 : vector<4x256xf32>
    %219 = arith.divf %217, %218 : vector<4x256xf32>
    %220 = arith.mulf %119, %219 : vector<4x256xf32>
    %221 = arith.addf %220, %3 : vector<4x256xf32>
    %c0_202 = arith.constant 0 : index
    %c0_203 = arith.constant 0 : index
    %c0_204 = arith.constant 0 : index
    %222 = vector.load %arg7[%c0_202, %c0_203, %c0_204] : memref<1x4x256xf32, #tpu.memory_space<vmem>>, vector<1x4x256xf32>
    %223 = vector.shape_cast %222 : vector<1x4x256xf32> to vector<4x256xf32>
    %224 = vector.shape_cast %221 : vector<4x256xf32> to vector<1x4x256xf32>
    tpu.vector_store %arg7[%c0_202, %c0_203, %c0_204], %224 {strides = array<i32>} : memref<1x4x256xf32, #tpu.memory_space<vmem>>, vector<1x4x256xf32>,
    return
  }
  func.func @transform_0(%arg0: i32) -> (i32, i32, i32) {
    %c0_i32 = arith.constant 0 : i32
    %c0_i32_0 = arith.constant 0 : i32
    %c0_i32_1 = arith.constant 0 : i32
    return %arg0, %c0_i32, %c0_i32_0 : i32, i32, i32
  }
  func.func @transform_1(%arg0: i32) -> (i32, i32, i32) {
    %c0_i32 = arith.constant 0 : i32
    %c0_i32_0 = arith.constant 0 : i32
    %c0_i32_1 = arith.constant 0 : i32
    return %arg0, %c0_i32, %c0_i32_0 : i32, i32, i32
  }
  func.func @transform_2(%arg0: i32) -> (i32, i32, i32) {
    %c0_i32 = arith.constant 0 : i32
    %c0_i32_0 = arith.constant 0 : i32
    %c0_i32_1 = arith.constant 0 : i32
    %c0_i32_2 = arith.constant 0 : i32
    return %c0_i32, %c0_i32_0, %c0_i32_1 : i32, i32, i32
  }
  func.func @transform_3(%arg0: i32) -> (i32, i32, i32) {
    %c0_i32 = arith.constant 0 : i32
    %c0_i32_0 = arith.constant 0 : i32
    %c0_i32_1 = arith.constant 0 : i32
    %c0_i32_2 = arith.constant 0 : i32
    return %c0_i32, %c0_i32_0, %c0_i32_1 : i32, i32, i32
  }
  func.func @transform_4(%arg0: i32) -> (i32, i32, i32) {
    %c0_i32 = arith.constant 0 : i32
    %c0_i32_0 = arith.constant 0 : i32
    %c0_i32_1 = arith.constant 0 : i32
    %c0_i32_2 = arith.constant 0 : i32
    return %c0_i32, %c0_i32_0, %c0_i32_1 : i32, i32, i32
  }
  func.func @transform_5(%arg0: i32) -> (i32, i32, i32) {
    %c0_i32 = arith.constant 0 : i32
    %c0_i32_0 = arith.constant 0 : i32
    %c0_i32_1 = arith.constant 0 : i32
    %c0_i32_2 = arith.constant 0 : i32
    return %c0_i32, %c0_i32_0, %c0_i32_1 : i32, i32, i32
  }
  func.func @transform_6(%arg0: i32) -> (i32, i32, i32) {
    %c0_i32 = arith.constant 0 : i32
    %c0_i32_0 = arith.constant 0 : i32
    %c0_i32_1 = arith.constant 0 : i32
    return %arg0, %c0_i32, %c0_i32_0 : i32, i32, i32
  }
  func.func @transform_7(%arg0: i32) -> (i32, i32, i32) {
    %c0_i32 = arith.constant 0 : i32
    %c0_i32_0 = arith.constant 0 : i32
    %c0_i32_1 = arith.constant 0 : i32
    return %arg0, %c0_i32, %c0_i32_0 : i32, i32, i32
  }
}

</mosaic_0001>

<bundles_post_ra>
// kernel: tpu_custom_call.1
= control target key start
LH: loop header
LB: loop body
LE: loop exit
PB: predicated region body
PF: predicated region fallthrough
CT: control target
= control target key end

     0   :  { %13 = vsyncpa [#allocation5], 0  ;;  %s4094_s0 = inlined_call_operand.vmem [shape: f32[2,4,256], index: 0, kind: input, shape index: {}]   ;;  %s4095_s1 = inlined_call_operand.vmem [shape: f32[2,3,256], index: 1, kind: input, shape index: {}]   ;;  %s4096_s2 = inlined_call_operand.vmem [shape: f32[9,4,4], index: 2, kind: input, shape index: {}]   ;;  %s4097_s3 = inlined_call_operand.vmem [shape: f32[9,3,4], index: 3, kind: input, shape index: {}]   ;;  %s4098_s4 = inlined_call_operand.vmem [shape: f32[9,4,3], index: 4, kind: input, shape index: {}]   ;;  %s4099_s5 = inlined_call_operand.vmem [shape: f32[9,1,256], index: 5, kind: input, shape index: {}]   ;;  %s4100_s6 = inlined_call_operand.hbm [shape: f32[2,4,256], index: 6, kind: output, shape index: {0}]   ;;  %s4101_s7 = inlined_call_operand.vmem [shape: f32[2,3,256], index: 7, kind: output, shape index: {1}]  }
   0x1   :  { %15 = vsyncpa [#allocation5 + $0x1], 0  ;;  %s3557_s24 = smov 0   ;;  %s3559_s25 = smov 0  }
   0x2   :  { %s3561_s26 = smov 0   ;;  %s3563_s27 = smov 0  }
   0x3 LB: > { %s3578_s28 = sadd.s32 4294967295, %s3505_s27   ;;  %s3194_s29 = sadd.s32 4294967294, %s3505_s27   ;;  %s3505_s27 = sphi %s3563_s27, %s4113_s27   ;;  %s3501_s26 = sphi %s3561_s26, %s4112_s26   ;;  %s3497_s25 = sphi %s3559_s25, %s4111_s25   ;;  %s3493_s24 = sphi %s3557_s24, %s4110_s24  }
   0x4   : > { %s3582_s30 = sadd.s32 1, %s3505_s27   ;;  %s164_s8 = sadd.s32 1, %s3501_s26 }
   0x5   : > { %s161_s9 = ssub.s32 %s3505_s27, %s3582_s30  ;;  %p174_p0 = scmp.ne.s32.totalorder %s3501_s26, %s3497_s25 }
   0x6   : > { %p162_p1 = scmp.eq.s32.totalorder %s161_s9, 0  ;;  %p175_p2 = scmp.eq.s32.totalorder %s3578_s28, 1 }
   0x7   : > { %p180_p3 = scmp.ne.s32.totalorder %s3497_s25, %s3493_s24  ;;  %p181_p4 = scmp.eq.s32.totalorder %s3194_s29, 1 }
   0x8   : > { %s3593_s10 = scalar_select %p162_p1, %s3501_s26, %s164_s8  }
   0x9   : > { %p3595_p5 = por %p175_p2, %p174_p0  ;;  %p3599_p6 = por %p181_p4, %p180_p3 }
   0xa   : > { %p3197_p7 = scmp.ge.s32.totalorder %s3505_s27, 1  ;;  %p253_p8 = scmp.lt.s32.totalorder %s3505_s27, 3 }
   0xc   : > { %p254_p9 = pnand %p3197_p7, %p253_p8 }
   0xd   : > { %v318_v0 = vlaneseq (!%p254_p9)  ;;  %v3205_v2 = vld [vmem:[%s4099_s5 + $0x2] sm:$0x3] (!%p254_p9)  ;;  %v316_v3 = vld [vmem:[%s4099_s5] sm:$0x3] (!%p254_p9)  ;;  %p295_p10 = scmp.lt.s32.totalorder (!%p254_p9), %s3578_s28, 1  ;;  %v3507_v8 = vmov (!%p254_p9), 0.0  }
   0xe   : > { %257 = sbr.rel (%p254_p9) target bundleno = 1070 (0x42e), region = 44  ;;  %v3220_v6 = vld [vmem:[%s4099_s5 + $0x4] sm:$0x3] (!%p254_p9)  ;;  %v3229_v7 = vld [vmem:[%s4099_s5 + $0x6] sm:$0x3] (!%p254_p9)  ;;  %310 = vst [vmem:[#allocation2] sm:$0xff] (!%p254_p9), %v3507_v8  ;;  %446 = vmatprep.mubr.f32.mxu1 (!%p254_p9), %v3507_v8  ;;  %1173 = vmatprep.mubr.f32.mxu0 (!%p254_p9), %v3507_v8 }
   0xf   : > { %v319_v1 = vshrl.u32 (!%p254_p9), %v318_v0, 7  ;;  %311 = vst [vmem:[#allocation2 + $0x8] sm:$0xff] (!%p254_p9), %v3507_v8  ;;  %2043 = vst [vmem:[#allocation3] sm:$0x77] (!%p254_p9), %v3507_v8  ;;  %v3247_v17 = vld [vmem:[%s4099_s5 + $0xa] sm:$0x3] (!%p254_p9) }
  0x10   : > { %2044 = vst [vmem:[#allocation3 + $0x8] sm:$0x77] (!%p254_p9), %v3507_v8  ;;  %v3256_v19 = vld [vmem:[%s4099_s5 + $0xc] sm:$0x3] (!%p254_p9)  ;;  %s3508_s16 = smov (!%p254_p9), 112   ;;  %s3509_s17 = smov (!%p254_p9), 113  }
  0x11   : > { %v3612_v4 = vsub.s32 (!%p254_p9), 0, %v319_v1  ;;  %v3614_v5 = vsub.s32 (!%p254_p9), 1, %v319_v1  ;;  %s4104_s18 = smov (!%p254_p9), 111   ;;  %s3511_s19 = smov (!%p254_p9), 127   ;;  %v3265_v30 = vld [vmem:[%s4099_s5 + $0xe] sm:$0x3] (!%p254_p9) }
  0x12   : > { %s3512_s20 = smov (!%p254_p9), 1   ;;  %vm353_vm0 = vcmask (!%p254_p9), 916480   ;;  %vm330_vm1 = vcmask (!%p254_p9), 908288   ;;  %s3514_s8 = smov (!%p254_p9), 16   ;;  %v3274_v45 = vld [vmem:[%s4099_s5 + $0x10] sm:$0x3] (!%p254_p9) }
  0x13   : > { %v344_v9 = vrot.slane (!%p254_p9), %v3205_v2, %v3612_v4  ;;  %v348_v10 = vrot.slane (!%p254_p9), %v3205_v2, %v3614_v5  ;;  %v321_v11 = vrot.slane (!%p254_p9), %v316_v3, %v3612_v4  ;;  %v325_v12 = vrot.slane (!%p254_p9), %v316_v3, %v3614_v5  ;;  %s4102_s14 = smov (!%p254_p9), 17   ;;  %s4108_s9 = smov (!%p254_p9), 17  }
  0x14   : > { %v701_v13 = vrot.slane (!%p254_p9), %v3220_v6, %v3612_v4  ;;  %v705_v14 = vrot.slane (!%p254_p9), %v3220_v6, %v3614_v5  ;;  %v896_v15 = vrot.slane (!%p254_p9), %v3229_v7, %v3612_v4  ;;  %v900_v16 = vrot.slane (!%p254_p9), %v3229_v7, %v3614_v5 }
  0x15   : > { %s296_s21 = scalar_select %p295_p10, %s3578_s28, 1  ;;  %v349_v18 = vcombine.low %v344_v9, %v348_v10  ;;  %v326_v22 = vcombine.low %v321_v11, %v325_v12  ;;  %v1268_v23 = vrot.slane %v3247_v17, %v3612_v4  ;;  %v1272_v24 = vrot.slane %v3247_v17, %v3614_v5 }
  0x16   : > { %v706_v20 = vcombine.low %v701_v13, %v705_v14  ;;  %v901_v25 = vcombine.low %v896_v15, %v900_v16  ;;  %v1461_v26 = vrot.slane %v3256_v19, %v3612_v4  ;;  %v1465_v27 = vrot.slane %v3256_v19, %v3614_v5  ;;  %v1261_v9 = vld [vmem:[#allocation2 + $0xc] sm:$0xf] }
  0x17   : > { %s3640_s29 = sshll.u32 %s296_s21, 3  ;;  %350 = vrot.lane.b32.xlu0 %v349_v18, %s3508_s16  ;;  %v1273_v28 = vcombine.low %v1268_v23, %v1272_v24  ;;  %s3513_s21 = smov 15   ;;  %v1654_v35 = vrot.slane %v3265_v30, %v3612_v4  ;;  %v1658_v36 = vrot.slane %v3265_v30, %v3614_v5  ;;  %v1847_v49 = vrot.slane %v3274_v45, %v3612_v4  ;;  %v1454_v17 = vld [vmem:[#allocation2 + $0xc] sm:$0xf]  ;;  %v3238_v18 = vld [vmem:[%s4099_s5 + $0x8] sm:$0x3] }
  0x18   : > { %s299_s15 = scalar_lea.vmem %s4094_s0, %s3640_s29  ;;  %707 = vrot.lane.b32.xlu1 %v706_v20, %s3509_s17  ;;  %v1466_v29 = vcombine.low %v1461_v26, %v1465_v27  ;;  %v1851_v50 = vrot.slane %v3274_v45, %v3614_v5  ;;  %vm710_vm2 = vcmask 924672   ;;  %vm905_vm3 = vcmask 1039360   ;;  %v3239_v26 = vld [vmem:[%s4096_s2 + $0x10] sm:$0xf]  ;;  %v3283_v45 = vld [vmem:[%s4099_s5 + $0x2] sm:$0x3]  ;;  %s304_s13 = scalar_lea.vmem %s4095_s1, %s3640_s29 }
  0x19   : > { %v3649_v21 = vld [vmem:[%s299_s15] sm:$0xff]  ;;  %v1659_v43 = vcombine.low %v1654_v35, %v1658_v36  ;;  %vm922_vm4 = vcmask 7168   ;;  %vm727_vm5 = vcmask 121856   ;;  %v1090_v19 = vrot.slane %v3238_v18, %v3612_v4 }
  0x1a   : > { %313 = vst [vmem:[#allocation2 + $0x4] sm:$0xff] %v3649_v21  ;;  %v1852_v54 = vcombine.low %v1847_v49, %v1851_v50  ;;  %v1094_v20 = vrot.slane %v3238_v18, %v3614_v5  ;;  %vm377_vm6 = vcmask 1043456   ;;  %vm373_vm7 = vcmask 31744   ;;  %v3206_v36 = vld [vmem:[%s4096_s2 + $0x4] sm:$0xf] }
  0x1b   : > { %327 = vrot.lane.b32.xlu0 %v326_v22, %s4104_s18  ;;  %vm370_vm8 = vcmask 130048   ;;  %vm462_vm9 = vcmask 138240   ;;  %v336_v49 = vld [vmem:[%s4096_s2] sm:$0xf]  ;;  %v3316_v18 = vld [vmem:[%s4099_s5 + $0xe] sm:$0x3] }
  0x1c   : > { %902 = vrot.lane.b32.xlu1 %v901_v25, %s3511_s19  ;;  %v1095_v23 = vcombine.low %v1090_v19, %v1094_v20  ;;  %v337_v19 = vld [vmem:[%s4097_s3] sm:$0x7]  ;;  %vm2104_vm10 = vcmask 1042432   ;;  %vm2100_vm11 = vcmask 23552  }
  0x1e   : > { %v3705_v24 = vmul.f32 %v1095_v23, %v3649_v21 }
  0x1f   : > { %1274 = vrot.lane.b32.xlu0 %v1273_v28, %s3512_s20 }
  0x20   : > { %1467 = vrot.lane.b32.xlu1 %v1466_v29, %s3513_s21  ;;  %v3710_v25 = vcombine.high %v3705_v24, %v3705_v24  ;;  %v1647_v29 = vld [vmem:[#allocation2 + $0xc] sm:$0xf] }
  0x21   : > { %v315_v32 = vld [vmem:[#allocation2 + $0x8] sm:$0xf]  ;;  %v314_v33 = vld [vmem:[#allocation2] sm:$0xff] }
  0x22   : > { %v694_v57 = vld [vmem:[#allocation2 + $0x8] sm:$0xf]  ;;  %3240 = vmatprep.subr.msk.mxu0 %vm377_vm6, %v3710_v25 }
  0x23   : > { %v889_v6 = vld [vmem:[#allocation2 + $0x8] sm:$0xf]  ;;  %3241 = vmatpush1.msk.msra.mxu0 %vm377_vm6, %v3705_v24 }
  0x24   : > { %3242 = vmatmul.mubr.msk.f32.vlgmr.msra.gmra.mrb[0].mxu0 %vm373_vm7, %v3239_v26 }
  0x25   : > { %1366 = vmatprep.mubr.f32.mxu0 %v3507_v8 }
  0x89   : > { %v351_v31 = vpop.permute.xlu0 %350 }
  0x8a   : > { %v352_v34 = vrot.slane %v351_v31, 4  ;;  %v708_v39 = vpop.permute.xlu1 %707 }
  0x8b   : > { %v709_v51 = vrot.slane %v708_v39, 4 }
  0x8c   : > { %v354_v37 = vsel %vm353_vm0, %v352_v34, %v351_v31  ;;  %v358_v38 = vmul.f32 %v352_v34, %v315_v32 }
  0x8d   : > { %v357_v40 = vmul.f32 %v354_v37, %v314_v33  ;;  %v328_v41 = vpop.permute.xlu0 %327  ;;  %v711_v55 = vsel %vm710_vm2, %v709_v51, %v708_v39  ;;  %v715_v60 = vmul.f32 %v709_v51, %v694_v57 }
  0x8e   : > { %368 = vrot.lane.b32.xlu1 %v358_v38, %s3514_s8  ;;  %v329_v42 = vrot.slane %v328_v41, 4  ;;  %v903_v47 = vpop.permute.xlu1 %902  ;;  %v714_v59 = vmul.f32 %v711_v55, %v314_v33  ;;  %v2077_v55 = vrot.slane %v3283_v45, %v3614_v5 }
  0x8f   : > { %v363_v44 = vcombine.high %v357_v40, %v357_v40  ;;  %v904_v53 = vrot.slane %v903_v47, 4 }
  0x90   : > { %v331_v46 = vsel %vm330_vm1, %v329_v42, %v328_v41  ;;  %v335_v48 = vmul.f32 %v329_v42, %v315_v32  ;;  %v720_v0 = vcombine.high %v714_v59, %v714_v59 }
  0x91   : > { %366 = vrot.lane.b32.xlu0 %v363_v44, %s3514_s8  ;;  %v334_v52 = vmul.f32 %v331_v46, %v314_v33  ;;  %v906_v58 = vsel %vm905_vm3, %v904_v53, %v903_v47  ;;  %v1275_v62 = vpop.permute.xlu0 %1274  ;;  %v910_v11 = vmul.f32 %v904_v53, %v889_v6  ;;  %v1840_v46 = vld [vmem:[#allocation2 + $0xc] sm:$0xf]  ;;  %v2048_v53 = vld [vmem:[%s4099_s5] sm:$0x3] }
  0x92   : > { %1660 = vrot.lane.b32.xlu1 %v1659_v43, %s3514_s8  ;;  %v909_v61 = vmul.f32 %v906_v58, %v314_v33  ;;  %v1468_v63 = vpop.permute.xlu1 %1467  ;;  %v1276_v2 = vrot.slane %v1275_v62, 4  ;;  %v3291_v58 = vld [vmem:[%s4099_s5 + $0x4] sm:$0x3] }
  0x93   : > { %v455_v56 = vcombine.high %v334_v52, %v334_v52  ;;  %v1469_v3 = vrot.slane %v1468_v63, 4  ;;  %v2280_v6 = vrot.slane %v3291_v58, %v3614_v5 }
  0x94   : > { %v915_v1 = vcombine.high %v909_v61, %v909_v61  ;;  %v1277_v7 = vsel %vm922_vm4, %v1276_v2, %v1275_v62  ;;  %v1281_v13 = vmul.f32 %v1276_v2, %v1261_v9  ;;  %v2053_v62 = vrot.slane %v2048_v53, %v3612_v4  ;;  %v3296_v2 = vld [vmem:[%s4099_s5 + $0x6] sm:$0x3] }
  0x95   : > { %364 = vrot.lane.b32.xlu0 %v357_v40, %s3514_s8  ;;  %v1470_v10 = vsel %vm727_vm5, %v1469_v3, %v1468_v63  ;;  %v1280_v12 = vmul.f32 %v1277_v7, %v3649_v21  ;;  %v1474_v22 = vmul.f32 %v1469_v3, %v1454_v17  ;;  %v2057_v63 = vrot.slane %v2048_v53, %v3614_v5  ;;  %v3306_v7 = vld [vmem:[%s4099_s5 + $0xa] sm:$0x3]  ;;  %v3234_v53 = vld [vmem:[%s4097_s3 + $0xc] sm:$0x7] }
  0x96   : > { %460 = vrot.lane.b32.xlu1 %v335_v48, %s4102_s14  ;;  %v1473_v14 = vmul.f32 %v1470_v10, %v3649_v21  ;;  %v2276_v3 = vrot.slane %v3291_v58, %v3612_v4  ;;  %v2606_v17 = vrot.slane %v3306_v7, %v3614_v5 }
  0x97   : > { %v1286_v15 = vcombine.high %v1280_v12, %v1280_v12 }
  0x98   : > { %v1479_v16 = vcombine.high %v1473_v14, %v1473_v14 }
  0x99   : > { %458 = vrot.lane.b32.xlu0 %v455_v56, %s4102_s14 }
  0x9a   : > { %1853 = vrot.lane.b32.xlu1 %v1852_v54, %s4102_s14  ;;  %v2073_v54 = vrot.slane %v3283_v45, %v3612_v4 }
  0x9d   : > { %456 = vrot.lane.b32.xlu0 %v334_v52, %s4102_s14  ;;  %s3336_s14 = sshll.u32 %s3578_s28, 7  ;;  %s3516_s28 = smov [#allocation4]  }
  0x9e   : > { %725 = vrot.lane.b32.xlu1 %v715_v60, %s3513_s21 }
  0xa1   : > { %723 = vrot.lane.b32.xlu0 %v720_v0, %s3513_s21 }
  0xa2   : > { %918 = vrot.lane.b32.xlu1 %v915_v1, %s3512_s20  ;;  %v2078_v1 = vcombine.low %v2073_v54, %v2077_v55  ;;  %v3257_v54 = vld [vmem:[%s4096_s2 + $0x18] sm:$0xf]  ;;  %v3243_v55 = vld [vmem:[%s4097_s3 + $0x10] sm:$0x7] }
  0xa5   : > { %721 = vrot.lane.b32.xlu0 %v714_v59, %s3513_s21  ;;  %v3213_v59 = vld [vmem:[%s4097_s3 + $0x4] sm:$0x7] }
  0xa6   : > { %916 = vrot.lane.b32.xlu1 %v909_v61, %s3512_s20 }
  0xa9   : > { %920 = vrot.lane.b32.xlu0 %v910_v11, %s3512_s20  ;;  %v2058_v11 = vcombine.low %v2053_v62, %v2057_v63 }
  0xaa   : > { %1291 = vrot.lane.b32.xlu1 %v1281_v13, %s3511_s19  ;;  %v2394_v13 = vrot.slane %v3296_v2, %v3614_v5 }
  0xad   : > { %1289 = vrot.lane.b32.xlu0 %v1286_v15, %s3511_s19  ;;  %v3311_v15 = vld [vmem:[%s4099_s5 + $0xc] sm:$0x3] }
  0xae   : > { %1482 = vrot.lane.b32.xlu1 %v1479_v16, %s3509_s17  ;;  %v2602_v16 = vrot.slane %v3306_v7, %v3612_v4 }
  0xb1   : > { %1287 = vrot.lane.b32.xlu0 %v1280_v12, %s3511_s19  ;;  %v2390_v12 = vrot.slane %v3296_v2, %v3612_v4 }
  0xb2   : > { %1480 = vrot.lane.b32.xlu1 %v1473_v14, %s3509_s17  ;;  %v2281_v14 = vcombine.low %v2276_v3, %v2280_v6  ;;  %v3275_v3 = vld [vmem:[%s4096_s2 + $0x20] sm:$0xf] }
  0xb3   : > { %v2395_v26 = vcombine.low %v2390_v12, %v2394_v13  ;;  %v3279_v6 = vld [vmem:[%s4097_s3 + $0x20] sm:$0x7] }
  0xb5   : > { %1484 = vrot.lane.b32.xlu0 %v1474_v22, %s3509_s17 }
 0x100   : > { %v369_v27 = vpop.permute.xlu1 %368 }
 0x103   : > { %v367_v28 = vpop.permute.xlu0 %366 }
 0x104   : > { %v1661_v30 = vpop.permute.xlu1 %1660  ;;  %v372_v31 = vsel %vm370_vm8, %v367_v28, %v369_v27  ;;  %v2716_v27 = vrot.slane %v3311_v15, %v3612_v4 }
 0x105   : > { %v1662_v32 = vrot.slane %v1661_v30, 4  ;;  %3207 = vmatprep.subr.msk.mxu1 %vm377_vm6, %v372_v31 }
 0x107   : > { %v1663_v33 = vsel %vm370_vm8, %v1662_v32, %v1661_v30  ;;  %v1667_v34 = vmul.f32 %v1662_v32, %v1647_v29  ;;  %v365_v35 = vpop.permute.xlu0 %364  ;;  %v2607_v29 = vcombine.low %v2602_v16, %v2606_v17  ;;  %v3321_v30 = vld [vmem:[%s4099_s5 + $0x10] sm:$0x3]  ;;  %v2834_v32 = vrot.slane %v3316_v18, %v3614_v5 }
 0x108   : > { %v1666_v37 = vmul.f32 %v1663_v33, %v3649_v21  ;;  %v461_v38 = vpop.permute.xlu1 %460  ;;  %v371_v39 = vsel %vm370_vm8, %v365_v35, %v367_v28  ;;  %v2720_v28 = vrot.slane %v3311_v15, %v3614_v5  ;;  %v3221_v33 = vld [vmem:[%s4096_s2 + $0x8] sm:$0xf] }
 0x109   : > { %1677 = vrot.lane.b32.xlu1 %v1667_v34, %s3508_s16  ;;  %3208 = vmatpush1.msk.msra.mxu1 %vm377_vm6, %v371_v39 }
 0x10a   : > { %3209 = vmatmul.mubr.msk.f32.vlgmr.msra.gmra.mrb[0].mxu1 %vm373_vm7, %v3206_v36  ;;  %v1672_v40 = vcombine.high %v1666_v37, %v1666_v37 }
 0x10b   : > { %v459_v41 = vpop.permute.xlu0 %458  ;;  %536 = vmatprep.mubr.f32.mxu1 %v3507_v8 }
 0x10c   : > { %v464_v42 = vsel %vm462_vm9, %v459_v41, %v461_v38  ;;  %v1854_v43 = vpop.permute.xlu1 %1853  ;;  %1675 = vrot.lane.b32.xlu0 %v1672_v40, %s3508_s16  ;;  %v2944_v38 = vrot.slane %v3321_v30, %v3612_v4  ;;  %v2948_v40 = vrot.slane %v3321_v30, %v3614_v5 }
 0x10d   : > { %v1855_v44 = vrot.slane %v1854_v43, 4  ;;  %3210 = vmatprep.subr.msk.mxu1 %vm377_vm6, %v464_v42 }
 0x10f   : > { %v1856_v47 = vsel %vm462_vm9, %v1855_v44, %v1854_v43  ;;  %v457_v48 = vpop.permute.xlu0 %456  ;;  %v1860_v56 = vmul.f32 %v1855_v44, %v1840_v46  ;;  %v3248_v44 = vld [vmem:[%s4096_s2 + $0x14] sm:$0xf] }
 0x110   : > { %v1859_v50 = vmul.f32 %v1856_v47, %v3649_v21  ;;  %v463_v51 = vsel %vm462_vm9, %v457_v48, %v459_v41  ;;  %1673 = vrot.lane.b32.xlu0 %v1666_v37, %s3508_s16  ;;  %v726_v52 = vpop.permute.xlu1 %725  ;;  %v2721_v37 = vcombine.low %v2716_v27, %v2720_v28  ;;  %v2949_v48 = vcombine.low %v2944_v38, %v2948_v40 }
 0x111   : > { %3211 = vmatpush1.msk.msra.mxu1 %vm377_vm6, %v463_v51 }
 0x112   : > { %3212 = vmatmul.mubr.msk.f32.vlgmr.msra.gmra.mrb[0].mxu1 %vm373_vm7, %v336_v49  ;;  %3214 = vmatprep.subr.msk.mxu1 %vm377_vm6, %v372_v31  ;;  %v1865_v57 = vcombine.high %v1859_v50, %v1859_v50  ;;  %v2830_v31 = vrot.slane %v3316_v18, %v3612_v4  ;;  %v3230_v49 = vld [vmem:[%s4096_s2 + $0xc] sm:$0xf] }
 0x113   : > { %3215 = vmatpush1.msk.msra.mxu1 %vm377_vm6, %v371_v39  ;;  %612 = vmatprep.mubr.f32.mxu1 %v3507_v8  ;;  %v724_v60 = vpop.permute.xlu0 %723 }
 0x114   : > { %1868 = vrot.lane.b32.xlu1 %v1865_v57, %s4104_s18  ;;  %1870 = vrot.lane.b32.xlu0 %v1860_v56, %s4104_s18  ;;  %v919_v61 = vpop.permute.xlu1 %918  ;;  %v729_v0 = vsel %vm727_vm5, %v724_v60, %v726_v52  ;;  %v2835_v41 = vcombine.low %v2830_v31, %v2834_v32 }
 0x115   : > { %3217 = vmatprep.subr.msk.mxu1 %vm377_vm6, %v464_v42  ;;  %v3225_v42 = vld [vmem:[%s4097_s3 + $0x8] sm:$0x7] }
 0x116   : > { %3216 = vmatmul.mubr.msk.f32.vlgmr.msra.gmra.mrb[2].mxu1 %vm373_vm7, %v3213_v59 }
 0x117   : > { %3218 = vmatpush1.msk.msra.mxu1 %vm377_vm6, %v463_v51  ;;  %686 = vmatprep.mubr.f32.mxu1 %v3507_v8  ;;  %v722_v9 = vpop.permute.xlu0 %721 }
 0x118   : > { %1866 = vrot.lane.b32.xlu1 %v1859_v50, %s4104_s18  ;;  %3222 = vmatprep.subr.msk.mxu1 %vm377_vm6, %v729_v0  ;;  %v917_v10 = vpop.permute.xlu1 %916  ;;  %v728_v22 = vsel %vm727_vm5, %v722_v9, %v724_v60  ;;  %v3266_v60 = vld [vmem:[%s4096_s2 + $0x1c] sm:$0xf] }
 0x119   : > { %2079 = vrot.lane.b32.xlu0 %v2078_v1, %s3508_s16  ;;  %v923_v45 = vsel %vm922_vm4, %v917_v10, %v919_v61 }
 0x11b   : > { %v921_v20 = vpop.permute.xlu0 %920 }
 0x11c   : > { %v1292_v23 = vpop.permute.xlu1 %1291  ;;  %2059 = vrot.lane.b32.xlu1 %v2058_v11, %s4104_s18  ;;  %v924_v39 = vsel %vm922_vm4, %v919_v61, %v921_v20  ;;  %v3270_v61 = vld [vmem:[%s4097_s3 + $0x1c] sm:$0x7]  ;;  %v2032_v11 = vld [vmem:[%s304_s13] sm:$0x77]  ;;  %s309_s18 = scalar_lea.vmem %s4101_s7, %s3640_s29  ;;  %s4109_s29 = smov 111  }
 0x11d   : > { %2282 = vrot.lane.b32.xlu0 %v2281_v14, %s3509_s17  ;;  %v2034_v12 = vcombine.high %v2032_v11, %v2032_v11 }
 0x11e   : > { %3219 = vmatmul.mubr.msk.f32.vlgmr.msra.gmra.mrb[2].mxu1 %vm373_vm7, %v337_v19 }
 0x11f   : > { %3223 = vmatpush1.msk.msra.mxu1 %vm377_vm6, %v728_v22  ;;  %801 = vmatprep.mubr.f32.mxu1 %v3507_v8  ;;  %v1290_v34 = vpop.permute.xlu0 %1289 }
 0x120   : > { %3226 = vmatprep.subr.msk.mxu1 %vm377_vm6, %v729_v0  ;;  %v1294_v35 = vsel %vm905_vm3, %v1290_v34, %v1292_v23  ;;  %v1483_v36 = vpop.permute.xlu1 %1482  ;;  %2396 = vrot.lane.b32.xlu1 %v2395_v26, %s3511_s19 }
 0x121   : > { %3249 = vmatprep.subr.msk.mxu0 %vm377_vm6, %v1294_v35  ;;  %2608 = vrot.lane.b32.xlu0 %v2607_v29, %s3512_s20 }
 0x122   : > { %3224 = vmatmul.mubr.msk.f32.vlgmr.msra.gmra.mrb[0].mxu1 %vm373_vm7, %v3221_v33 }
 0x123   : > { %3227 = vmatpush1.msk.msra.mxu1 %vm377_vm6, %v728_v22  ;;  %879 = vmatprep.mubr.f32.mxu1 %v3507_v8  ;;  %v1288_v43 = vpop.permute.xlu0 %1287 }
 0x124   : > { %3231 = vmatprep.subr.msk.mxu1 %vm377_vm6, %v924_v39  ;;  %v1293_v46 = vsel %vm905_vm3, %v1288_v43, %v1290_v34  ;;  %v1481_v47 = vpop.permute.xlu1 %1480  ;;  %2722 = vrot.lane.b32.xlu1 %v2721_v37, %s3513_s21 }
 0x125   : > { %3250 = vmatpush1.msk.msra.mxu0 %vm377_vm6, %v1293_v46  ;;  %2836 = vrot.lane.b32.xlu0 %v2835_v41, %s3514_s8  ;;  %v1486_v51 = vsel %vm710_vm2, %v1481_v47, %v1483_v36 }
 0x126   : > { %3228 = vmatmul.mubr.msk.f32.vlgmr.msra.gmra.mrb[2].mxu1 %vm373_vm7, %v3225_v42  ;;  %3251 = vmatmul.mubr.msk.f32.vlgmr.msra.gmra.mrb[0].mxu0 %vm373_vm7, %v3248_v44 }
 0x127   : > { %3232 = vmatpush1.msk.msra.mxu1 %vm377_vm6, %v923_v45  ;;  %996 = vmatprep.mubr.f32.mxu1 %v3507_v8  ;;  %v1485_v50 = vpop.permute.xlu0 %1484 }
 0x128   : > { %3235 = vmatprep.subr.msk.mxu1 %vm377_vm6, %v924_v39  ;;  %v1487_v52 = vsel %vm710_vm2, %v1483_v36, %v1485_v50  ;;  %1559 = vmatprep.mubr.f32.mxu0 %v3507_v8 }
 0x129   : > { %3258 = vmatprep.subr.msk.mxu0 %vm377_vm6, %v1487_v52  ;;  %2950 = vrot.lane.b32.xlu1 %v2949_v48, %s4108_s9 }
 0x12a   : > { %3233 = vmatmul.mubr.msk.f32.vlgmr.msra.gmra.mrb[0].mxu1 %vm373_vm7, %v3230_v49  ;;  %3259 = vmatpush1.msk.msra.mxu0 %vm377_vm6, %v1486_v51 }
 0x12b   : > { %3236 = vmatpush1.msk.msra.mxu1 %vm377_vm6, %v923_v45  ;;  %1074 = vmatprep.mubr.f32.mxu1 %v3507_v8 }
 0x12c   : > { %3244 = vmatprep.subr.msk.mxu1 %vm377_vm6, %v3710_v25  ;;  %v3261_v25 = vld [vmem:[%s4097_s3 + $0x18] sm:$0x7] }
 0x12e   : > { %3237 = vmatmul.mubr.msk.f32.vlgmr.msra.gmra.mrb[2].mxu1 %vm373_vm7, %v3234_v53  ;;  %3260 = vmatmul.mubr.msk.f32.vlgmr.msra.gmra.mrb[0].mxu0 %vm373_vm7, %v3257_v54 }
 0x12f   : > { %3245 = vmatpush1.msk.msra.mxu1 %vm377_vm6, %v3705_v24  ;;  %1251 = vmatprep.mubr.f32.mxu1 %v3507_v8  ;;  %v3252_v24 = vld [vmem:[%s4097_s3 + $0x14] sm:$0x7] }
 0x130   : > { %3253 = vmatprep.subr.msk.mxu1 %vm377_vm6, %v1294_v35  ;;  %1752 = vmatprep.mubr.f32.mxu0 %v3507_v8 }
 0x136   : > { %3246 = vmatmul.mubr.msk.f32.vlgmr.msra.gmra.mrb[2].mxu1 %vm373_vm7, %v3243_v55 }
 0x137   : > { %3254 = vmatpush1.msk.msra.mxu1 %vm377_vm6, %v1293_v46  ;;  %1444 = vmatprep.mubr.f32.mxu1 %v3507_v8 }
 0x138   : > { %3262 = vmatprep.subr.msk.mxu1 %vm377_vm6, %v1487_v52 }
 0x13e   : > { %3255 = vmatmul.mubr.msk.f32.vlgmr.msra.gmra.mrb[2].mxu1 %vm373_vm7, %v3252_v24 }
 0x13f   : > { %3263 = vmatpush1.msk.msra.mxu1 %vm377_vm6, %v1486_v51  ;;  %1637 = vmatprep.mubr.f32.mxu1 %v3507_v8 }
 0x146   : > { %3264 = vmatmul.mubr.msk.f32.vlgmr.msra.gmra.mrb[2].mxu1 %vm373_vm7, %v3261_v25  ;;  %v2596_v25 = vld [vmem:[#allocation3 + $0xc] sm:$0x7] }
 0x147   : > { %1830 = vmatprep.mubr.f32.mxu1 %v3507_v8 }
 0x17b   : > { %v1678_v56 = vpop.permute.xlu1 %1677 }
 0x17e   : > { %v1676_v57 = vpop.permute.xlu0 %1675 }
 0x17f   : > { %v1680_v58 = vsel %vm353_vm0, %v1676_v57, %v1678_v56 }
 0x180   : > { %3267 = vmatprep.subr.msk.mxu0 %vm377_vm6, %v1680_v58  ;;  %3271 = vmatprep.subr.msk.mxu1 %vm377_vm6, %v1680_v58 }
 0x182   : > { %v1674_v59 = vpop.permute.xlu0 %1673 }
 0x183   : > { %v1679_v62 = vsel %vm353_vm0, %v1674_v59, %v1676_v57 }
 0x184   : > { %3268 = vmatpush1.msk.msra.mxu0 %vm377_vm6, %v1679_v62  ;;  %3272 = vmatpush1.msk.msra.mxu1 %vm377_vm6, %v1679_v62 }
 0x185   : > { %3269 = vmatmul.mubr.msk.f32.vlgmr.msra.gmra.mrb[0].mxu0 %vm373_vm7, %v3266_v60  ;;  %3273 = vmatmul.mubr.msk.f32.vlgmr.msra.gmra.mrb[2].mxu1 %vm373_vm7, %v3270_v61 }
 0x186   : > { %v1869_v63 = vpop.permute.xlu1 %1868  ;;  %v1871_v0 = vpop.permute.xlu0 %1870  ;;  %1945 = vmatprep.mubr.f32.mxu0 %v3507_v8  ;;  %2023 = vmatprep.mubr.f32.mxu1 %v3507_v8 }
 0x187   : > { %v1873_v1 = vsel %vm330_vm1, %v1869_v63, %v1871_v0 }
 0x188   : > { %3276 = vmatprep.subr.msk.mxu0 %vm377_vm6, %v1873_v1  ;;  %3280 = vmatprep.subr.msk.mxu1 %vm377_vm6, %v1873_v1 }
 0x18a   : > { %v1867_v2 = vpop.permute.xlu1 %1866 }
 0x18b   : > { %v1872_v7 = vsel %vm330_vm1, %v1867_v2, %v1869_v63  ;;  %v2080_v27 = vpop.permute.xlu0 %2079 }
 0x18c   : > { %3277 = vmatpush1.msk.msra.mxu0 %vm377_vm6, %v1872_v7  ;;  %3281 = vmatpush1.msk.msra.mxu1 %vm377_vm6, %v1872_v7  ;;  %v2081_v28 = vrot.slane %v2080_v27, 4 }
 0x18d   : > { %3278 = vmatmul.mubr.msk.f32.vlgmr.msra.gmra.mrb[0].mxu0 %vm373_vm7, %v3275_v3  ;;  %3282 = vmatmul.mubr.msk.f32.vlgmr.msra.gmra.mrb[2].mxu1 %vm373_vm7, %v3279_v6 }
 0x18e   : > { %2173 = vmatprep.mubr.f32.mxu0 %v3507_v8  ;;  %v2060_v23 = vpop.permute.xlu1 %2059  ;;  %v2082_v31 = vsel %vm353_vm0, %v2081_v28, %v2080_v27  ;;  %v2938_v27 = vld [vmem:[#allocation3 + $0xc] sm:$0x7] }
 0x18f   : > { %v2061_v26 = vrot.slane %v2060_v23, 4  ;;  %v2283_v36 = vpop.permute.xlu0 %2282 }
 0x190   : > { %v2284_v39 = vrot.slane %v2283_v36, 4 }
 0x191   : > { %v2062_v29 = vsel %vm330_vm1, %v2061_v26, %v2060_v23 }
 0x192   : > { %v2397_v38 = vpop.permute.xlu1 %2396  ;;  %v2285_v43 = vsel %vm710_vm2, %v2284_v39, %v2283_v36 }
 0x193   : > { %v2398_v41 = vrot.slane %v2397_v38, 4  ;;  %v2609_v51 = vpop.permute.xlu0 %2608 }
 0x194   : > { %v2610_v54 = vrot.slane %v2609_v51, 4 }
 0x195   : > { %v2399_v45 = vsel %vm905_vm3, %v2398_v41, %v2397_v38  ;;  %v3301_v38 = vld [vmem:[%s4099_s5 + $0x8] sm:$0x3] }
 0x196   : > { %v2723_v53 = vpop.permute.xlu1 %2722  ;;  %v2611_v58 = vsel %vm922_vm4, %v2610_v54, %v2609_v51  ;;  %v2615_v61 = vmul.f32 %v2610_v54, %v2596_v25 }
 0x197   : > { %v2724_v24 = vrot.slane %v2723_v53, 4  ;;  %v2837_v1 = vpop.permute.xlu0 %2836 }
 0x198   : > { %v2838_v6 = vrot.slane %v2837_v1, 4 }
 0x199   : > { %v2725_v60 = vsel %vm727_vm5, %v2724_v24, %v2723_v53  ;;  %v3292_v53 = vld [vmem:[%s4098_s4 + $0x8] sm:$0xf] }
 0x19b   : > { %v2951_v2 = vpop.permute.xlu1 %2950 }
 0x1fd   : > { %v998_v9 = vpop.f32.mrb[0].mxu1 }
 0x1fe   : > { %v1000_v10 = vpop.f32.mrb[1].mxu1 }
 0x260   : > { %v1947_v13 = vpop.f32.mrb[0].mxu0  ;;  %v2025_v14 = vpop.f32.mrb[2].mxu1 }
 0x261   : > { %v3919_v15 = vadd.f32 %v1947_v13, %v998_v9  ;;  %v2036_v16 = vadd.f32 %v2032_v11, %v2025_v14  ;;  %v1949_v17 = vpop.f32.mrb[1].mxu0  ;;  %v2027_v18 = vpop.f32.mrb[3].mxu1  ;;  %v2952_v9 = vrot.slane %v2951_v2, 4  ;;  %v2824_v11 = vld [vmem:[#allocation3 + $0xc] sm:$0x7]  ;;  %v2839_v13 = vsel %vm370_vm8, %v2838_v6, %v2837_v1 }
 0x262   : > { %v3921_v19 = vadd.f32 %v1949_v17, %v1000_v10  ;;  %v2037_v20 = vadd.f32 %v2034_v12, %v2027_v18  ;;  %v2710_v10 = vld [vmem:[#allocation3 + $0xc] sm:$0x7]  ;;  %v2843_v18 = vmul.f32 %v2838_v6, %v2824_v11  ;;  %v3312_v11 = vld [vmem:[%s4098_s4 + $0x18] sm:$0xf] }
 0x263   : > { %v2729_v14 = vmul.f32 %v2724_v24, %v2710_v10  ;;  %v2953_v17 = vsel %vm462_vm9, %v2952_v9, %v2951_v2 }
 0x264   : > { %v2040_v22 = vcombine.low %v2036_v16, %v2037_v20 }
 0x266   : > { %2042 = vst [vmem:[%s309_s18] sm:$0x77] %v2040_v22  ;;  %2045 = vst [vmem:[#allocation3 + $0x4] sm:$0x77] %v2040_v22 }
 0x26d   : > { %v2047_v30 = vld [vmem:[#allocation3 + $0x8] sm:$0x7]  ;;  %v2046_v33 = vld [vmem:[#allocation3] sm:$0x77] }
 0x26e   : > { %v2086_v32 = vmul.f32 %v2081_v28, %v2047_v30  ;;  %v2085_v34 = vmul.f32 %v2082_v31, %v2046_v33  ;;  %v2065_v35 = vmul.f32 %v2062_v29, %v2046_v33  ;;  %v2269_v42 = vld [vmem:[#allocation3] sm:$0x77]  ;;  %v2270_v46 = vld [vmem:[#allocation3 + $0x8] sm:$0x7]  ;;  %v2066_v48 = vmul.f32 %v2061_v26, %v2047_v30 }
 0x26f   : > { %v2383_v44 = vld [vmem:[#allocation3] sm:$0x77]  ;;  %v2288_v47 = vmul.f32 %v2285_v43, %v2269_v42  ;;  %v2289_v50 = vmul.f32 %v2284_v39, %v2270_v46  ;;  %v2384_v56 = vld [vmem:[#allocation3 + $0x8] sm:$0x7]  ;;  %v2957_v28 = vmul.f32 %v2952_v9, %v2938_v27  ;;  %v2503_v42 = vrot.slane %v3301_v38, %v3612_v4 }
 0x270   : > { %2096 = vrot.lane.b32.xlu1 %v2086_v32, %s3514_s8  ;;  %v2091_v37 = vcombine.high %v2085_v34, %v2085_v34  ;;  %v2182_v40 = vcombine.high %v2065_v35, %v2065_v35  ;;  %v2402_v49 = vmul.f32 %v2399_v45, %v2383_v44  ;;  %v2595_v57 = vld [vmem:[#allocation3 + $0x4] sm:$0x77]  ;;  %v2403_v62 = vmul.f32 %v2398_v41, %v2384_v56  ;;  %v2067_v45 = vld [vmem:[%s4098_s4] sm:$0xf]  ;;  %v3297_v56 = vld [vmem:[%s4098_s4 + $0xc] sm:$0xf] }
 0x271   : > { %v2294_v52 = vcombine.high %v2288_v47, %v2288_v47  ;;  %v2709_v59 = vld [vmem:[#allocation3 + $0x4] sm:$0x77]  ;;  %v2614_v63 = vmul.f32 %v2611_v58, %v2595_v57  ;;  %v2507_v43 = vrot.slane %v3301_v38, %v3614_v5 }
 0x272   : > { %2094 = vrot.lane.b32.xlu0 %v2091_v37, %s3514_s8  ;;  %v2408_v55 = vcombine.high %v2402_v49, %v2402_v49  ;;  %v2728_v0 = vmul.f32 %v2725_v60, %v2709_v59  ;;  %v2823_v12 = vld [vmem:[#allocation3 + $0x4] sm:$0x77] }
 0x273   : > { %v2620_v3 = vcombine.high %v2614_v63, %v2614_v63  ;;  %v2937_v16 = vld [vmem:[#allocation3 + $0x4] sm:$0x77]  ;;  %v2842_v20 = vmul.f32 %v2839_v13, %v2823_v12 }
 0x274   : > { %2185 = vrot.lane.b32.xlu1 %v2182_v40, %s4108_s9  ;;  %v2734_v7 = vcombine.high %v2728_v0, %v2728_v0  ;;  %v2956_v22 = vmul.f32 %v2953_v17, %v2937_v16 }
 0x275   : > { %v2848_v23 = vcombine.high %v2842_v20, %v2842_v20 }
 0x276   : > { %2092 = vrot.lane.b32.xlu0 %v2085_v34, %s3514_s8  ;;  %v2962_v26 = vcombine.high %v2956_v22, %v2956_v22  ;;  %v3284_v34 = vld [vmem:[%s4098_s4 + $0x4] sm:$0xf]  ;;  %s285_s8 = sand.u32 1, %s3497_s25  }
 0x278   : > { %2183 = vrot.lane.b32.xlu1 %v2065_v35, %s4108_s9 }
 0x27a   : > { %2187 = vrot.lane.b32.xlu0 %v2066_v48, %s4108_s9  ;;  %v2508_v48 = vcombine.low %v2503_v42, %v2507_v43  ;;  %s3198_s9 = sshll.u32 %s285_s8, 3 }
 0x27b   : > { %s287_s23 = scalar_lea.vmem [#allocation4], %s3198_s9 }
 0x27c   : > { %2299 = vrot.lane.b32.xlu1 %v2289_v50, %s3513_s21  ;;  %v2497_v50 = vld [vmem:[#allocation3 + $0x4] sm:$0x77]  ;;  %s3095_s13 = sshll.u32 %s287_s23, 4  ;;  %s4054_s13 = int_to_ptr.vmem [resolvable:$true] %s3095_s13 }
 0x27d   : > { %v2510_v5 = vmul.f32 %v2508_v48, %v2497_v50  ;;  %s3443_s18 = scalar_lea.vmem %s4054_s13, 128 }
 0x27e   : > { %2297 = vrot.lane.b32.xlu0 %v2294_v52, %s3513_s21  ;;  %p3444_p11 = scmp.ne.s32.totalorder %s4054_s13, %s3443_s18 }
 0x27f   : > { %v2514_v24 = vcombine.high %v2510_v5, %v2510_v5 }
 0x280   : > { %2411 = vrot.lane.b32.xlu1 %v2408_v55, %s3512_s20  ;;  %p3445_p12 = pnand %p3444_p11, %p3595_p5 }
 0x282   : > { %2295 = vrot.lane.b32.xlu0 %v2288_v47, %s3513_s21  ;;  %p3446_p13 = pneg %p3445_p12 }
 0x284   : > { %2409 = vrot.lane.b32.xlu1 %v2402_v49, %s3512_s20 }
 0x286   : > { %2413 = vrot.lane.b32.xlu0 %v2403_v62, %s3512_s20  ;;  %v3302_v62 = vld [vmem:[%s4098_s4 + $0x10] sm:$0xf] }
 0x288   : > { %2625 = vrot.lane.b32.xlu1 %v2615_v61, %s3511_s19 }
 0x28a   : > { %2623 = vrot.lane.b32.xlu0 %v2620_v3, %s3511_s19  ;;  %v3307_v3 = vld [vmem:[%s4098_s4 + $0x14] sm:$0xf] }
 0x28c   : > { %2737 = vrot.lane.b32.xlu1 %v2734_v7, %s3509_s17 }
 0x28e   : > { %2621 = vrot.lane.b32.xlu0 %v2614_v63, %s3511_s19 }
 0x290   : > { %2735 = vrot.lane.b32.xlu1 %v2728_v0, %s3509_s17 }
 0x292   : > { %2739 = vrot.lane.b32.xlu0 %v2729_v14, %s3509_s17  ;;  %s3076_s17 = scalar_lea.sflag [#allocation5], %s285_s8 }
 0x294   : > { %2853 = vrot.lane.b32.xlu1 %v2843_v18, %s3508_s16  ;;  %v3317_v18 = vld [vmem:[%s4098_s4 + $0x1c] sm:$0xf] }
 0x296   : > { %2851 = vrot.lane.b32.xlu0 %v2848_v23, %s3508_s16 }
 0x298   : > { %2965 = vrot.lane.b32.xlu1 %v2962_v26, %s4109_s29 }
 0x29a   : > { %2849 = vrot.lane.b32.xlu0 %v2842_v20, %s3508_s16  ;;  %s3447_s16 = sshll.u32 %s3516_s28, 4  ;;  %s3448_s16 = int_to_ptr.vmem [resolvable:$false] %s3447_s16 }
 0x29b   : > { %s3449_s19 = scalar_lea.vmem %s3448_s16, 256  ;;  %p3450_p0 = scmp.lt.s32.totalorder %s4054_s13, %s3448_s16 }
 0x29c   : > { %2963 = vrot.lane.b32.xlu1 %v2956_v22, %s4109_s29  ;;  %v3322_v22 = vld [vmem:[%s4098_s4 + $0x20] sm:$0xf]  ;;  %p3451_p1 = scmp.lt.s32.totalorder %s3449_s19, %s3443_s18 }
 0x29e   : > { %2967 = vrot.lane.b32.xlu0 %v2957_v28, %s4109_s29  ;;  %s4052_s29 = scalar_lea.hbm %s4100_s6, %s3336_s14  ;;  %p3452_p2 = por %p3451_p1, %p3450_p0 }
 0x2a0   : > { %p3453_p3 = pnand %p3452_p2, %p3446_p13 }
 0x2e2   : > { %v2097_v29 = vpop.permute.xlu1 %2096 }
 0x2e4   : > { %v2095_v30 = vpop.permute.xlu0 %2094 }
 0x2e5   : > { %v2099_v31 = vsel %vm370_vm8, %v2095_v30, %v2097_v29 }
 0x2e6   : > { %v2186_v32 = vpop.permute.xlu1 %2185  ;;  %3285 = vmatprep.subr.msk.mxu0 %vm2104_vm10, %v2099_v31 }
 0x2e8   : > { %v2093_v33 = vpop.permute.xlu0 %2092 }
 0x2e9   : > { %v2098_v35 = vsel %vm370_vm8, %v2093_v33, %v2095_v30  ;;  %v3066_v33 = vcombine.high %v3649_v21, %v3649_v21 }
 0x2ea   : > { %v2184_v36 = vpop.permute.xlu1 %2183  ;;  %3286 = vmatpush1.msk.msra.mxu0 %vm2104_vm10, %v2098_v35 }
 0x2eb   : > { %3287 = vmatmul.mubr.msk.f32.vlgmr.msra.gmra.mrb[2].mxu0 %vm2100_vm11, %v3284_v34  ;;  %v2189_v41 = vsel %vm462_vm9, %v2184_v36, %v2186_v32 }
 0x2ec   : > { %v2188_v37 = vpop.permute.xlu0 %2187  ;;  %2262 = vmatprep.mubr.f32.mxu0 %v3507_v8 }
 0x2ed   : > { %v2190_v39 = vsel %vm462_vm9, %v2186_v32, %v2188_v37 }
 0x2ee   : > { %v2300_v40 = vpop.permute.xlu1 %2299  ;;  %3288 = vmatprep.subr.msk.mxu0 %vm2104_vm10, %v2190_v39 }
 0x2ef   : > { %3289 = vmatpush1.msk.msra.mxu0 %vm2104_vm10, %v2189_v41 }
 0x2f0   : > { %v2298_v44 = vpop.permute.xlu0 %2297 }
 0x2f1   : > { %v2302_v46 = vsel %vm727_vm5, %v2298_v44, %v2300_v40 }
 0x2f2   : > { %v2412_v47 = vpop.permute.xlu1 %2411  ;;  %3293 = vmatprep.subr.msk.mxu0 %vm2104_vm10, %v2302_v46 }
 0x2f3   : > { %3290 = vmatmul.mubr.msk.f32.vlgmr.msra.gmra.mrb[2].mxu0 %vm2100_vm11, %v2067_v45 }
 0x2f4   : > { %v2296_v49 = vpop.permute.xlu0 %2295  ;;  %2374 = vmatprep.mubr.f32.mxu0 %v3507_v8 }
 0x2f5   : > { %v2301_v4 = vsel %vm727_vm5, %v2296_v49, %v2298_v44 }
 0x2f6   : > { %3294 = vmatpush1.msk.msra.mxu0 %vm2104_vm10, %v2301_v4  ;;  %v2410_v51 = vpop.permute.xlu1 %2409 }
 0x2f7   : > { %v2415_v55 = vsel %vm922_vm4, %v2410_v51, %v2412_v47 }
 0x2f8   : > { %v2414_v52 = vpop.permute.xlu0 %2413 }
 0x2f9   : > { %v2416_v54 = vsel %vm922_vm4, %v2412_v47, %v2414_v52 }
 0x2fa   : > { %3298 = vmatprep.subr.msk.mxu0 %vm2104_vm10, %v2416_v54  ;;  %v2626_v57 = vpop.permute.xlu1 %2625 }
 0x2fb   : > { %3295 = vmatmul.mubr.msk.f32.vlgmr.msra.gmra.mrb[2].mxu0 %vm2100_vm11, %v3292_v53 }
 0x2fc   : > { %3299 = vmatpush1.msk.msra.mxu0 %vm2104_vm10, %v2415_v55  ;;  %v2624_v25 = vpop.permute.xlu0 %2623  ;;  %2488 = vmatprep.mubr.f32.mxu0 %v3507_v8 }
 0x2fd   : > { %3303 = vmatprep.subr.msk.mxu0 %vm2104_vm10, %v2514_v24  ;;  %v2628_v59 = vsel %vm905_vm3, %v2624_v25, %v2626_v57 }
 0x2fe   : > { %v2738_v60 = vpop.permute.xlu1 %2737 }
 0x300   : > { %v2622_v58 = vpop.permute.xlu0 %2621 }
 0x301   : > { %v2627_v63 = vsel %vm905_vm3, %v2622_v58, %v2624_v25 }
 0x302   : > { %v2736_v1 = vpop.permute.xlu1 %2735 }
 0x303   : > { %3300 = vmatmul.mubr.msk.f32.vlgmr.msra.gmra.mrb[2].mxu0 %vm2100_vm11, %v3297_v56  ;;  %v2741_v6 = vsel %vm710_vm2, %v2736_v1, %v2738_v60 }
 0x304   : > { %3304 = vmatpush1.msk.msra.mxu0 %vm2104_vm10, %v2510_v5  ;;  %2586 = vmatprep.mubr.f32.mxu0 %v3507_v8  ;;  %v2740_v61 = vpop.permute.xlu0 %2739 }
 0x305   : > { %3308 = vmatprep.subr.msk.mxu0 %vm2104_vm10, %v2628_v59  ;;  %v2742_v0 = vsel %vm710_vm2, %v2738_v60, %v2740_v61 }
 0x306   : > { %v2854_v7 = vpop.permute.xlu1 %2853 }
 0x308   : > { %v2852_v2 = vpop.permute.xlu0 %2851 }
 0x309   : > { %v2856_v10 = vsel %vm353_vm0, %v2852_v2, %v2854_v7 }
 0x30a   : > { %v2966_v13 = vpop.permute.xlu1 %2965 }
 0x30b   : > { %3305 = vmatmul.mubr.msk.f32.vlgmr.msra.gmra.mrb[2].mxu0 %vm2100_vm11, %v3302_v62 }
 0x30c   : > { %3309 = vmatpush1.msk.msra.mxu0 %vm2104_vm10, %v2627_v63  ;;  %2700 = vmatprep.mubr.f32.mxu0 %v3507_v8  ;;  %v2850_v9 = vpop.permute.xlu0 %2849 }
 0x30d   : > { %3313 = vmatprep.subr.msk.mxu0 %vm2104_vm10, %v2742_v0  ;;  %v2855_v14 = vsel %vm353_vm0, %v2850_v9, %v2852_v2 }
 0x30e   : > { %v2964_v17 = vpop.permute.xlu1 %2963 }
 0x30f   : > { %v2969_v20 = vsel %vm330_vm1, %v2964_v17, %v2966_v13 }
 0x310   : > { %v2968_v12 = vpop.permute.xlu0 %2967 }
 0x311   : > { %v2970_v16 = vsel %vm330_vm1, %v2966_v13, %v2968_v12 }
 0x313   : > { %3310 = vmatmul.mubr.msk.f32.vlgmr.msra.gmra.mrb[2].mxu0 %vm2100_vm11, %v3307_v3 }
 0x314   : > { %3314 = vmatpush1.msk.msra.mxu0 %vm2104_vm10, %v2741_v6  ;;  %2814 = vmatprep.mubr.f32.mxu0 %v3507_v8 }
 0x315   : > { %3318 = vmatprep.subr.msk.mxu0 %vm2104_vm10, %v2856_v10 }
 0x31b   : > { %3315 = vmatmul.mubr.msk.f32.vlgmr.msra.gmra.mrb[2].mxu0 %vm2100_vm11, %v3312_v11 }
 0x31c   : > { %3319 = vmatpush1.msk.msra.mxu0 %vm2104_vm10, %v2855_v14  ;;  %2928 = vmatprep.mubr.f32.mxu0 %v3507_v8 }
 0x31d   : > { %3323 = vmatprep.subr.msk.mxu0 %vm2104_vm10, %v2970_v16 }
 0x323   : > { %3320 = vmatmul.mubr.msk.f32.vlgmr.msra.gmra.mrb[2].mxu0 %vm2100_vm11, %v3317_v18 }
 0x324   : > { %3324 = vmatpush1.msk.msra.mxu0 %vm2104_vm10, %v2969_v20  ;;  %3042 = vmatprep.mubr.f32.mxu0 %v3507_v8 }
 0x32b   : > { %3325 = vmatmul.mubr.msk.f32.vlgmr.msra.gmra.mrb[2].mxu0 %vm2100_vm11, %v3322_v22 }
 0x3fe   : > { %v3044_v23 = vpop.f32.mrb[2].mxu0 }
 0x3ff   : > { %v3326_v26 = vmul.f32 -1.442695, %v3044_v23  ;;  %v3046_v27 = vpop.f32.mrb[3].mxu0 }
 0x400   : > { %v3327_v28 = vmul.f32 -1.442695, %v3046_v27 }
 0x401   : > { %3435 = vpow2.f32 %v3326_v26 }
 0x402   : > { %3437 = vpow2.f32 %v3327_v28 }
 0x40b   : > { %v3436_v29 = vpop.eup %3435 }
 0x40c   : > { %v3438_v30 = vpop.eup %3437  ;;  %v3057_v31 = vadd.f32 1.0, %v3436_v29 }
 0x40d   : > { %v3058_v32 = vadd.f32 1.0, %v3438_v30 }
 0x40e   : > { %3439 = vrcp.f32 %v3057_v31 }
 0x40f   : > { %3441 = vrcp.f32 %v3058_v32 }
 0x418   : > { %v3440_v8 = vpop.eup %3439 }
 0x419   : > { %v3442_v34 = vpop.eup %3441  ;;  %v3063_v35 = vmul.f32 %v3440_v8, %v3919_v15 }
 0x41a   : > { %v3064_v36 = vmul.f32 %v3442_v34, %v3921_v19 }
 0x41b   : > { %v3068_v37 = vadd.f32 %v3063_v35, %v3649_v21 }
 0x41c   : > { %v3069_v38 = vadd.f32 %v3066_v33, %v3064_v36 }
 0x41e   : > { %v3072_v39 = vcombine.low %v3068_v37, %v3069_v38 }
 0x420   : > { %3074 = vst [vmem:[%s287_s23] sm:$0xff] %v3072_v39 }
 0x421   : > { %3456 = shalt.err (!%p3453_p3)
}
 0x422   : > { %s3457_s20 = scalar_lea.hbm %s4052_s29, 128  ;;  %s3461_s9 = scalar_lea.hbm %s4100_s6, 256 }
 0x423   : > { %p3458_p4 = scmp.ne.s32.totalorder %s4052_s29, %s3457_s20  ;;  %p3462_p9 = scmp.lt.u32.totalorder %s4052_s29, %s4100_s6 }
 0x424   : > { %p3463_p10 = scmp.lt.u32.totalorder %s3461_s9, %s3457_s20  ;;  %p3465_p12 = scmp.lt.u32.totalorder %s3457_s20, %s4052_s29 }
 0x425   : > { %p3459_p7 = pnand %p3458_p4, %p3595_p5 }
 0x426   : > { %p3464_p11 = por %p3463_p10, %p3462_p9 }
 0x427   : > { %p3460_p8 = pneg %p3459_p7 }
 0x428   : > { %p3466_p13 = por %p3465_p12, %p3464_p11 }
 0x42a   : > { %p3467_p0 = pnand %p3466_p13, %p3460_p8 }
 0x42c   : > { %3470 = shalt.err (!%p3467_p0)
}
 0x42d   : > { %3385 = dma.vmem_to_hbm [thread:$0]  (%p3595_p5), %s4054_s13, 128, %s4052_s29, %s3076_s17  }
 0x42e PF: > { %p3391_p1 = scmp.ge.s32.totalorder %s3505_s27, 2  ;;  %s3110_s15 = sand.u32 1, %s3493_s24  }
 0x42f   : > { %s3111_s22 = scalar_lea.sflag [#allocation5], %s3110_s15 }
 0x430   : > { %p3388_p2 = pnand %p3391_p1, %p3599_p6 }
 0x432   : > { %3488 = dma.done.wait (!%p3388_p2), %s3111_s22, 128  }
 0x433   : > { %3490 = vsyncadd (!%p3388_p2), %s3111_s22, 4294967168  ;;  %p18_p3 = scmp.ge.s32.totalorder %s3582_s30, 4   ;;  %s4110_s24 = smov %s3497_s25 }
 0x434   : > { %s4111_s25 = smov %s3501_s26  ;;  %s4112_s26 = smov %s3593_s10 }
 0x435   : > { %s4113_s27 = smov %s3582_s30  ;;  %20 = sbr.rel (!%p18_p3) target bundleno = 3 (0x3), region = 126 }
 0x43c   :  { %3124 = vsyncpa [#allocation5], 1 }
 0x43d   :  { %3126 = vsyncpa [#allocation5 + $0x1], 1 }

</bundles_post_ra>
